<compile_context>
chip_gen: v7x
topology: tpu7x:2x2x1
jax: 0.10.0
libtpu: 0.0.40
codegen_flags: <defaults>
</compile_context>

<pallas_src>
import functools
import math

import jax
import jax.numpy as jnp
from jax.experimental import pallas as pl
from jax.experimental.pallas import tpu as pltpu

CLIP_MEAN = (0.48145466, 0.4578275, 0.40821073)
CLIP_STD = (0.26862954, 0.26130258, 0.27577711)

CFG = dict(image_size=32, patch_size=16, width=32, layers=2, heads=4, out_dim=16)


# ----------------------------- fused Pallas kernel --------------------------

def _clip_encoder_kernel(*refs, num_layers, num_heads):
    """Whole CLIP image encoder for one batch element, entirely in VMEM."""
    patches_ref, tok_bias_ref, w_patch_ref, g_pre_ref, b_pre_ref = refs[:5]
    layer_refs = refs[5:5 + 12 * num_layers]
    g_post_ref, b_post_ref, proj_ref, o_ref = refs[5 + 12 * num_layers:]

    D = w_patch_ref.shape[-1]
    hd = D // num_heads
    scale = 1.0 / math.sqrt(hd)

    def layernorm(x, g_ref, b_ref):                       # f32 vector math
        mu = jnp.mean(x, axis=-1, keepdims=True)
        var = jnp.mean(jnp.square(x - mu), axis=-1, keepdims=True)
        return (x - mu) * jax.lax.rsqrt(var + 1e-5) * g_ref[...] + b_ref[...]

    def mm(x, w_ref):                                     # bf16 MXU, f32 accum
        return jnp.dot(x.astype(jnp.bfloat16), w_ref[...],
                       preferred_element_type=jnp.float32)

    # patch embedding (Normalize folded into w_patch / tok_bias) -------------
    patches = patches_ref[0]                              # [S, C*P*P] f32
    h = mm(patches, w_patch_ref) + tok_bias_ref[...]      # [S, D]
    h = layernorm(h, g_pre_ref, b_pre_ref)                # ln_pre

    for l in range(num_layers):
        (g1, b1, w_in, b_in, w_out, b_out,
         g2, b2, fc1_w, fc1_b, fc2_w, fc2_b) = layer_refs[12 * l:12 * (l + 1)]

        # --- x = x + attn(ln_1(x)) ------------------------------------------
        hn = layernorm(h, g1, b1)
        qkv = mm(hn, w_in) + b_in[...]                    # [S, 3D]
        q = qkv[:, 0:D] * scale
        k = qkv[:, D:2 * D]
        v = qkv[:, 2 * D:3 * D]
        w_out_val = w_out[...]                            # [D, D] bf16

        a_out = None
        for hh in range(num_heads):
            sl = slice(hh * hd, (hh + 1) * hd)
            qh = q[:, sl].astype(jnp.bfloat16)
            kh = k[:, sl].astype(jnp.bfloat16)
            vh = v[:, sl].astype(jnp.bfloat16)
            s = jnp.einsum("qd,kd->qk", qh, kh,
                           preferred_element_type=jnp.float32)    # [S, S]
            p = jnp.exp(s - jnp.max(s, axis=-1, keepdims=True))
            p = p * pl.reciprocal(jnp.sum(p, axis=-1, keepdims=True), approx=True)
            oh = jnp.einsum("qk,kd->qd", p.astype(jnp.bfloat16), vh,
                            preferred_element_type=jnp.float32)   # [S, hd]
            # fold the per-head slice of the out-projection in directly
            contrib = jnp.dot(oh.astype(jnp.bfloat16), w_out_val[sl, :],
                              preferred_element_type=jnp.float32)
            a_out = contrib if a_out is None else a_out + contrib
        h = h + a_out + b_out[...]                        # residual in-kernel

        # --- x = x + mlp(ln_2(x)) ---------------------------------------------
        hn2 = layernorm(h, g2, b2)
        m1 = mm(hn2, fc1_w) + fc1_b[...]                  # [S, 4D]
        m1 = m1 * jax.nn.sigmoid(1.702 * m1)              # QuickGELU (f32)
        h = h + mm(m1, fc2_w) + fc2_b[...]                # residual in-kernel

    # ln_post on the class token + output projection --------------------------
    cls = layernorm(h[0:1, :], g_post_ref, b_post_ref)    # [1, D]
    o_ref[0] = jnp.dot(cls.astype(jnp.bfloat16), proj_ref[...],
                       preferred_element_type=jnp.float32)


# ------------------------------- wrapper -------------------------------------

def _full_spec(arr):
    nd = arr.ndim
    return pl.BlockSpec(arr.shape, lambda b, _nd=nd: (0,) * _nd)


def clip_encoder_forward(x, params, cfg):
    B, C, H, W = x.shape
    D, P, nh, L = cfg["width"], cfg["patch_size"], cfg["heads"], cfg["layers"]
    out_dim = cfg["out_dim"]
    g = H // P
    n_patches = g * g
    S = n_patches + 1
    CPP = C * P * P

    mean = jnp.asarray(CLIP_MEAN, jnp.float32)
    std = jnp.asarray(CLIP_STD, jnp.float32)

    # Fold torchvision Normalize into the patch-embedding matmul.
    conv_w = params["conv_w"]                                         # [D,C,P,P]
    w_patch = (conv_w / std[None, :, None, None]).reshape(D, CPP).T   # [CPP, D]
    norm_bias = -jnp.sum(
        conv_w.reshape(D, C, P * P) * (mean / std)[None, :, None], axis=(1, 2))  # [D]

    # Per-token additive term: cls row absorbs class_embedding, patch rows
    # absorb the folded Normalize bias; all rows get the positional embedding.
    pos = params["pos_embedding"]                                     # [S, D]
    tok_bias = jnp.concatenate(
        [(pos[0] + params["class_embedding"])[None, :],
         pos[1:] + norm_bias[None, :]], axis=0)                       # [S, D]

    # Raw-pixel patches (layout glue only); row 0 per batch is the zero row
    # standing in for the class token (its embedding lives in tok_bias[0]).
    patches = x.reshape(B, C, g, P, g, P).transpose(0, 2, 4, 1, 3, 5)
    patches = patches.reshape(B, n_patches, CPP)
    patches = jnp.concatenate(
        [jnp.zeros((B, 1, CPP), jnp.float32), patches], axis=1)       # [B,S,CPP]

    bf16 = jnp.bfloat16
    inputs = [patches, tok_bias, w_patch.astype(bf16),
              params["ln_pre"][0], params["ln_pre"][1]]
    for lp in params["layers"]:
        inputs += [lp["ln1"][0], lp["ln1"][1],
                   lp["attn_w_in"].astype(bf16), lp["attn_b_in"],
                   lp["attn_w_out"].astype(bf16), lp["attn_b_out"],
                   lp["ln2"][0], lp["ln2"][1],
                   lp["fc1_w"].astype(bf16), lp["fc1_b"],
                   lp["fc2_w"].astype(bf16), lp["fc2_b"]]
    inputs += [params["ln_post"][0], params["ln_post"][1],
               params["proj"].astype(bf16)]

    in_specs = [pl.BlockSpec((1, S, CPP), lambda b: (b, 0, 0))]       # per-batch
    in_specs += [_full_spec(a) for a in inputs[1:]]                   # resident

    kernel = functools.partial(_clip_encoder_kernel, num_layers=L, num_heads=nh)
    out = pl.pallas_call(
        kernel,
        out_shape=jax.ShapeDtypeStruct((B, 1, out_dim), jnp.float32),
        grid=(B,),
        in_specs=in_specs,
        out_specs=pl.BlockSpec((1, 1, out_dim), lambda b: (b, 0, 0)),
        compiler_params=pltpu.CompilerParams(dimension_semantics=("parallel",)),
    )(*inputs)
    return out.reshape(B, out_dim)


# ----------------------------- parameters ------------------------------------

def init_clip_params(key, cfg):
    D, P, L = cfg["width"], cfg["patch_size"], cfg["layers"]
    g = cfg["image_size"] // P
    S = g * g + 1
    keys = jax.random.split(key, 4 + L)

    def nrm(k, shape, scale=0.02):
        return scale * jax.random.normal(k, shape, dtype=jnp.float32)

    params = {
        "conv_w": nrm(keys[0], (D, 3, P, P)),           # conv1: no bias in CLIP
        "class_embedding": nrm(keys[1], (D,)),
        "pos_embedding": nrm(keys[2], (S, D)),
        "ln_pre": (jnp.ones((1, D), jnp.float32), jnp.zeros((1, D), jnp.float32)),
        "ln_post": (jnp.ones((1, D), jnp.float32), jnp.zeros((1, D), jnp.float32)),
        "proj": nrm(keys[3], (D, cfg["out_dim"])),      # no bias
        "layers": [],
    }
    for l in range(L):
        lk = jax.random.split(keys[4 + l], 6)
        params["layers"].append({
            "ln1": (jnp.ones((1, D), jnp.float32), jnp.zeros((1, D), jnp.float32)),
            "attn_w_in": nrm(lk[0], (D, 3 * D)),
            "attn_b_in": nrm(lk[1], (1, 3 * D)),
            "attn_w_out": nrm(lk[2], (D, D)),
            "attn_b_out": jnp.zeros((1, D), jnp.float32),
            "ln2": (jnp.ones((1, D), jnp.float32), jnp.zeros((1, D), jnp.float32)),
            "fc1_w": nrm(lk[3], (D, 4 * D)),
            "fc1_b": jnp.zeros((1, 4 * D), jnp.float32),
            "fc2_w": nrm(lk[4], (4 * D, D)),
            "fc2_b": nrm(lk[5], (1, D)),
        })
    return params


# ------------------------ pure-JAX reference (f32) ---------------------------

def clip_encoder_reference(x, params, cfg):
    B, C, H, W = x.shape
    D, P, nh = cfg["width"], cfg["patch_size"], cfg["heads"]
    hd = D // nh
    g = H // P
    n_patches = g * g
    S = n_patches + 1

    mean = jnp.asarray(CLIP_MEAN, jnp.float32)[None, :, None, None]
    std = jnp.asarray(CLIP_STD, jnp.float32)[None, :, None, None]
    xn = (x - mean) / std

    patches = xn.reshape(B, C, g, P, g, P).transpose(0, 2, 4, 1, 3, 5)
    patches = patches.reshape(B, n_patches, C * P * P)
    tok = patches @ params["conv_w"].reshape(D, -1).T
    cls = jnp.broadcast_to(params["class_embedding"][None, None, :], (B, 1, D))
    h = jnp.concatenate([cls, tok], axis=1) + params["pos_embedding"][None]

    def ln(x, gb):
        g_, b_ = gb
        mu = x.mean(-1, keepdims=True)
        var = ((x - mu) ** 2).mean(-1, keepdims=True)
        return (x - mu) * jax.lax.rsqrt(var + 1e-5) * g_ + b_

    h = ln(h, params["ln_pre"])
    for lp in params["layers"]:
        hn = ln(h, lp["ln1"])
        qkv = hn @ lp["attn_w_in"] + lp["attn_b_in"]
        qkv = qkv.reshape(B, S, 3, nh, hd).transpose(2, 0, 3, 1, 4)
        q, k, v = qkv[0], qkv[1], qkv[2]
        s = jnp.einsum("bhqd,bhkd->bhqk", q, k) / math.sqrt(hd)
        p = jax.nn.softmax(s, axis=-1)
        a = jnp.einsum("bhqk,bhkd->bhqd", p, v).transpose(0, 2, 1, 3).reshape(B, S, D)
        h = h + a @ lp["attn_w_out"] + lp["attn_b_out"]
        hn = ln(h, lp["ln2"])
        m = hn @ lp["fc1_w"] + lp["fc1_b"]
        m = m * jax.nn.sigmoid(1.702 * m)
        h = h + m @ lp["fc2_w"] + lp["fc2_b"]
    cls_tok = ln(h[:, 0, :], params["ln_post"])
    return cls_tok @ params["proj"]


# --------------------------------- main ---------------------------------------

if __name__ == "__main__":
    key = jax.random.PRNGKey(0)
    kx, kp = jax.random.split(key)
    # NCHW image batch in [0, 1], like the PyTorch module's input
    x = jax.random.uniform(kx, (2, 3, CFG["image_size"], CFG["image_size"]),
                           dtype=jnp.float32)
    params = init_clip_params(kp, CFG)
    out = clip_encoder_forward(x, params, CFG)
    out = jax.block_until_ready(out)
    assert out.shape == (2, CFG["out_dim"]), out.shape
    assert bool(jnp.all(jnp.isfinite(out)))
    ref = clip_encoder_reference(x, params, CFG)
    err = float(jnp.max(jnp.abs(out - ref)))
    assert err < 5e-2, f"mismatch vs reference: {err}"
    print("KERNEL_OK")
</pallas_src>

<mosaic_0001>
module attributes {stable_mosaic.version = 11 : i64} {
  func.func @_clip_encoder_kernel(%arg0: i32, %arg1: memref<1x5x768xf32, #tpu.memory_space<vmem>>, %arg2: memref<5x32xf32, #tpu.memory_space<vmem>>, %arg3: memref<768x32xbf16, #tpu.memory_space<vmem>>, %arg4: memref<1x32xf32, #tpu.memory_space<vmem>>, %arg5: memref<1x32xf32, #tpu.memory_space<vmem>>, %arg6: memref<1x32xf32, #tpu.memory_space<vmem>>, %arg7: memref<1x32xf32, #tpu.memory_space<vmem>>, %arg8: memref<32x96xbf16, #tpu.memory_space<vmem>>, %arg9: memref<1x96xf32, #tpu.memory_space<vmem>>, %arg10: memref<32x32xbf16, #tpu.memory_space<vmem>>, %arg11: memref<1x32xf32, #tpu.memory_space<vmem>>, %arg12: memref<1x32xf32, #tpu.memory_space<vmem>>, %arg13: memref<1x32xf32, #tpu.memory_space<vmem>>, %arg14: memref<32x128xbf16, #tpu.memory_space<vmem>>, %arg15: memref<1x128xf32, #tpu.memory_space<vmem>>, %arg16: memref<128x32xbf16, #tpu.memory_space<vmem>>, %arg17: memref<1x32xf32, #tpu.memory_space<vmem>>, %arg18: memref<1x32xf32, #tpu.memory_space<vmem>>, %arg19: memref<1x32xf32, #tpu.memory_space<vmem>>, %arg20: memref<32x96xbf16, #tpu.memory_space<vmem>>, %arg21: memref<1x96xf32, #tpu.memory_space<vmem>>, %arg22: memref<32x32xbf16, #tpu.memory_space<vmem>>, %arg23: memref<1x32xf32, #tpu.memory_space<vmem>>, %arg24: memref<1x32xf32, #tpu.memory_space<vmem>>, %arg25: memref<1x32xf32, #tpu.memory_space<vmem>>, %arg26: memref<32x128xbf16, #tpu.memory_space<vmem>>, %arg27: memref<1x128xf32, #tpu.memory_space<vmem>>, %arg28: memref<128x32xbf16, #tpu.memory_space<vmem>>, %arg29: memref<1x32xf32, #tpu.memory_space<vmem>>, %arg30: memref<1x32xf32, #tpu.memory_space<vmem>>, %arg31: memref<1x32xf32, #tpu.memory_space<vmem>>, %arg32: memref<32x16xbf16, #tpu.memory_space<vmem>>, %arg33: memref<1x1x16xf32, #tpu.memory_space<vmem>>) attributes {dimension_semantics = [#tpu.dimension_semantics<parallel>], iteration_bounds = array<i64: 2>, scalar_prefetch = 0 : i64, scratch_operands = 0 : i64, tpu.core_type = #tpu.core_type<tc>, window_params = [{transform_indices = @transform_0, window_bounds = array<i64: 1, 5, 768>}, {pipeline_mode = #tpu.pipeline_mode<synchronous>, transform_indices = @transform_1, window_bounds = array<i64: 5, 32>}, {pipeline_mode = #tpu.pipeline_mode<synchronous>, transform_indices = @transform_2, window_bounds = array<i64: 768, 32>}, {pipeline_mode = #tpu.pipeline_mode<synchronous>, transform_indices = @transform_3, window_bounds = array<i64: 1, 32>}, {pipeline_mode = #tpu.pipeline_mode<synchronous>, transform_indices = @transform_4, window_bounds = array<i64: 1, 32>}, {pipeline_mode = #tpu.pipeline_mode<synchronous>, transform_indices = @transform_5, window_bounds = array<i64: 1, 32>}, {pipeline_mode = #tpu.pipeline_mode<synchronous>, transform_indices = @transform_6, window_bounds = array<i64: 1, 32>}, {pipeline_mode = #tpu.pipeline_mode<synchronous>, transform_indices = @transform_7, window_bounds = array<i64: 32, 96>}, {pipeline_mode = #tpu.pipeline_mode<synchronous>, transform_indices = @transform_8, window_bounds = array<i64: 1, 96>}, {pipeline_mode = #tpu.pipeline_mode<synchronous>, transform_indices = @transform_9, window_bounds = array<i64: 32, 32>}, {pipeline_mode = #tpu.pipeline_mode<synchronous>, transform_indices = @transform_10, window_bounds = array<i64: 1, 32>}, {pipeline_mode = #tpu.pipeline_mode<synchronous>, transform_indices = @transform_11, window_bounds = array<i64: 1, 32>}, {pipeline_mode = #tpu.pipeline_mode<synchronous>, transform_indices = @transform_12, window_bounds = array<i64: 1, 32>}, {pipeline_mode = #tpu.pipeline_mode<synchronous>, transform_indices = @transform_13, window_bounds = array<i64: 32, 128>}, {pipeline_mode = #tpu.pipeline_mode<synchronous>, transform_indices = @transform_14, window_bounds = array<i64: 1, 128>}, {pipeline_mode = #tpu.pipeline_mode<synchronous>, transform_indices = @transform_15, window_bounds = array<i64: 128, 32>}, {pipeline_mode = #tpu.pipeline_mode<synchronous>, transform_indices = @transform_16, window_bounds = array<i64: 1, 32>}, {pipeline_mode = #tpu.pipeline_mode<synchronous>, transform_indices = @transform_17, window_bounds = array<i64: 1, 32>}, {pipeline_mode = #tpu.pipeline_mode<synchronous>, transform_indices = @transform_18, window_bounds = array<i64: 1, 32>}, {pipeline_mode = #tpu.pipeline_mode<synchronous>, transform_indices = @transform_19, window_bounds = array<i64: 32, 96>}, {pipeline_mode = #tpu.pipeline_mode<synchronous>, transform_indices = @transform_20, window_bounds = array<i64: 1, 96>}, {pipeline_mode = #tpu.pipeline_mode<synchronous>, transform_indices = @transform_21, window_bounds = array<i64: 32, 32>}, {pipeline_mode = #tpu.pipeline_mode<synchronous>, transform_indices = @transform_22, window_bounds = array<i64: 1, 32>}, {pipeline_mode = #tpu.pipeline_mode<synchronous>, transform_indices = @transform_23, window_bounds = array<i64: 1, 32>}, {pipeline_mode = #tpu.pipeline_mode<synchronous>, transform_indices = @transform_24, window_bounds = array<i64: 1, 32>}, {pipeline_mode = #tpu.pipeline_mode<synchronous>, transform_indices = @transform_25, window_bounds = array<i64: 32, 128>}, {pipeline_mode = #tpu.pipeline_mode<synchronous>, transform_indices = @transform_26, window_bounds = array<i64: 1, 128>}, {pipeline_mode = #tpu.pipeline_mode<synchronous>, transform_indices = @transform_27, window_bounds = array<i64: 128, 32>}, {pipeline_mode = #tpu.pipeline_mode<synchronous>, transform_indices = @transform_28, window_bounds = array<i64: 1, 32>}, {pipeline_mode = #tpu.pipeline_mode<synchronous>, transform_indices = @transform_29, window_bounds = array<i64: 1, 32>}, {pipeline_mode = #tpu.pipeline_mode<synchronous>, transform_indices = @transform_30, window_bounds = array<i64: 1, 32>}, {pipeline_mode = #tpu.pipeline_mode<synchronous>, transform_indices = @transform_31, window_bounds = array<i64: 32, 16>}, {transform_indices = @transform_32, window_bounds = array<i64: 1, 1, 16>}]} {
    %c0 = arith.constant 0 : index
    %c0_0 = arith.constant 0 : index
    %c0_1 = arith.constant 0 : index
    %0 = vector.load %arg1[%c0, %c0_0, %c0_1] : memref<1x5x768xf32, #tpu.memory_space<vmem>>, vector<1x5x768xf32>
    %1 = vector.shape_cast %0 : vector<1x5x768xf32> to vector<5x768xf32>
    %2 = arith.truncf %1 : vector<5x768xf32> to vector<5x768xbf16>
    %c0_2 = arith.constant 0 : index
    %c0_3 = arith.constant 0 : index
    %3 = vector.load %arg3[%c0_2, %c0_3] : memref<768x32xbf16, #tpu.memory_space<vmem>>, vector<768x32xbf16>
    %cst = arith.constant dense<0.000000e+00> : vector<5x32xf32>
    %4 = tpu.matmul %2, %3, %cst {dimension_numbers = #tpu.dot_dimension_numbers<[1], [0], [0], [1], [0, 0, 1, 1], [], []>} : vector<5x768xbf16>, vector<768x32xbf16>, vector<5x32xf32> -> vector<5x32xf32>
    %c0_4 = arith.constant 0 : index
    %c0_5 = arith.constant 0 : index
    %5 = vector.load %arg2[%c0_4, %c0_5] : memref<5x32xf32, #tpu.memory_space<vmem>>, vector<5x32xf32>
    %6 = arith.addf %4, %5 : vector<5x32xf32>
    %cst_6 = arith.constant dense<0.000000e+00> : vector<5xf32>
    %7 = vector.multi_reduction <add>, %6, %cst_6 [1] : vector<5x32xf32> to vector<5xf32>
    %8 = vector.shape_cast %7 : vector<5xf32> to vector<5x1xf32>
    %cst_7 = arith.constant 3.200000e+01 : f32
    %9 = vector.broadcast %cst_7 : f32 to vector<5x1xf32>
    %10 = arith.divf %8, %9 : vector<5x1xf32>
    %11 = vector.broadcast %10 : vector<5x1xf32> to vector<5x32xf32>
    %12 = arith.subf %6, %11 : vector<5x32xf32>
    %13 = arith.mulf %12, %12 : vector<5x32xf32>
    %cst_8 = arith.constant dense<0.000000e+00> : vector<5xf32>
    %14 = vector.multi_reduction <add>, %13, %cst_8 [1] : vector<5x32xf32> to vector<5xf32>
    %15 = vector.shape_cast %14 : vector<5xf32> to vector<5x1xf32>
    %cst_9 = arith.constant 3.200000e+01 : f32
    %16 = vector.broadcast %cst_9 : f32 to vector<5x1xf32>
    %17 = arith.divf %15, %16 : vector<5x1xf32>
    %18 = vector.broadcast %10 : vector<5x1xf32> to vector<5x32xf32>
    %19 = arith.subf %6, %18 : vector<5x32xf32>
    %cst_10 = arith.constant 9.99999974E-6 : f32
    %20 = vector.broadcast %cst_10 : f32 to vector<5x1xf32>
    %21 = arith.addf %17, %20 : vector<5x1xf32>
    %22 = math.rsqrt %21 : vector<5x1xf32>
    %23 = vector.broadcast %22 : vector<5x1xf32> to vector<5x32xf32>
    %24 = arith.mulf %19, %23 : vector<5x32xf32>
    %c0_11 = arith.constant 0 : index
    %c0_12 = arith.constant 0 : index
    %25 = vector.load %arg4[%c0_11, %c0_12] : memref<1x32xf32, #tpu.memory_space<vmem>>, vector<1x32xf32>
    %26 = vector.broadcast %25 : vector<1x32xf32> to vector<5x32xf32>
    %27 = arith.mulf %24, %26 : vector<5x32xf32>
    %c0_13 = arith.constant 0 : index
    %c0_14 = arith.constant 0 : index
    %28 = vector.load %arg5[%c0_13, %c0_14] : memref<1x32xf32, #tpu.memory_space<vmem>>, vector<1x32xf32>
    %29 = vector.broadcast %28 : vector<1x32xf32> to vector<5x32xf32>
    %30 = arith.addf %27, %29 : vector<5x32xf32>
    %cst_15 = arith.constant dense<0.000000e+00> : vector<5xf32>
    %31 = vector.multi_reduction <add>, %30, %cst_15 [1] : vector<5x32xf32> to vector<5xf32>
    %32 = vector.shape_cast %31 : vector<5xf32> to vector<5x1xf32>
    %cst_16 = arith.constant 3.200000e+01 : f32
    %33 = vector.broadcast %cst_16 : f32 to vector<5x1xf32>
    %34 = arith.divf %32, %33 : vector<5x1xf32>
    %35 = vector.broadcast %34 : vector<5x1xf32> to vector<5x32xf32>
    %36 = arith.subf %30, %35 : vector<5x32xf32>
    %37 = arith.mulf %36, %36 : vector<5x32xf32>
    %cst_17 = arith.constant dense<0.000000e+00> : vector<5xf32>
    %38 = vector.multi_reduction <add>, %37, %cst_17 [1] : vector<5x32xf32> to vector<5xf32>
    %39 = vector.shape_cast %38 : vector<5xf32> to vector<5x1xf32>
    %cst_18 = arith.constant 3.200000e+01 : f32
    %40 = vector.broadcast %cst_18 : f32 to vector<5x1xf32>
    %41 = arith.divf %39, %40 : vector<5x1xf32>
    %42 = vector.broadcast %34 : vector<5x1xf32> to vector<5x32xf32>
    %43 = arith.subf %30, %42 : vector<5x32xf32>
    %cst_19 = arith.constant 9.99999974E-6 : f32
    %44 = vector.broadcast %cst_19 : f32 to vector<5x1xf32>
    %45 = arith.addf %41, %44 : vector<5x1xf32>
    %46 = math.rsqrt %45 : vector<5x1xf32>
    %47 = vector.broadcast %46 : vector<5x1xf32> to vector<5x32xf32>
    %48 = arith.mulf %43, %47 : vector<5x32xf32>
    %c0_20 = arith.constant 0 : index
    %c0_21 = arith.constant 0 : index
    %49 = vector.load %arg6[%c0_20, %c0_21] : memref<1x32xf32, #tpu.memory_space<vmem>>, vector<1x32xf32>
    %50 = vector.broadcast %49 : vector<1x32xf32> to vector<5x32xf32>
    %51 = arith.mulf %48, %50 : vector<5x32xf32>
    %c0_22 = arith.constant 0 : index
    %c0_23 = arith.constant 0 : index
    %52 = vector.load %arg7[%c0_22, %c0_23] : memref<1x32xf32, #tpu.memory_space<vmem>>, vector<1x32xf32>
    %53 = vector.broadcast %52 : vector<1x32xf32> to vector<5x32xf32>
    %54 = arith.addf %51, %53 : vector<5x32xf32>
    %55 = arith.truncf %54 : vector<5x32xf32> to vector<5x32xbf16>
    %c0_24 = arith.constant 0 : index
    %c0_25 = arith.constant 0 : index
    %56 = vector.load %arg8[%c0_24, %c0_25] : memref<32x96xbf16, #tpu.memory_space<vmem>>, vector<32x96xbf16>
    %cst_26 = arith.constant dense<0.000000e+00> : vector<5x96xf32>
    %57 = tpu.matmul %55, %56, %cst_26 {dimension_numbers = #tpu.dot_dimension_numbers<[1], [0], [0], [1], [0, 0, 1, 1], [], []>} : vector<5x32xbf16>, vector<32x96xbf16>, vector<5x96xf32> -> vector<5x96xf32>
    %c0_27 = arith.constant 0 : index
    %c0_28 = arith.constant 0 : index
    %58 = vector.load %arg9[%c0_27, %c0_28] : memref<1x96xf32, #tpu.memory_space<vmem>>, vector<1x96xf32>
    %59 = vector.broadcast %58 : vector<1x96xf32> to vector<5x96xf32>
    %60 = arith.addf %57, %59 : vector<5x96xf32>
    %61 = vector.extract_strided_slice %60 {offsets = [0, 0], sizes = [5, 32], strides = [1, 1]} : vector<5x96xf32> to vector<5x32xf32>
    %cst_29 = arith.constant 0.353553385 : f32
    %62 = vector.broadcast %cst_29 : f32 to vector<5x32xf32>
    %63 = arith.mulf %61, %62 : vector<5x32xf32>
    %64 = vector.extract_strided_slice %60 {offsets = [0, 32], sizes = [5, 32], strides = [1, 1]} : vector<5x96xf32> to vector<5x32xf32>
    %65 = vector.extract_strided_slice %60 {offsets = [0, 64], sizes = [5, 32], strides = [1, 1]} : vector<5x96xf32> to vector<5x32xf32>
    %c0_30 = arith.constant 0 : index
    %c0_31 = arith.constant 0 : index
    %66 = vector.load %arg10[%c0_30, %c0_31] : memref<32x32xbf16, #tpu.memory_space<vmem>>, vector<32x32xbf16>
    %67 = vector.extract_strided_slice %63 {offsets = [0, 0], sizes = [5, 8], strides = [1, 1]} : vector<5x32xf32> to vector<5x8xf32>
    %68 = arith.truncf %67 : vector<5x8xf32> to vector<5x8xbf16>
    %69 = vector.extract_strided_slice %64 {offsets = [0, 0], sizes = [5, 8], strides = [1, 1]} : vector<5x32xf32> to vector<5x8xf32>
    %70 = arith.truncf %69 : vector<5x8xf32> to vector<5x8xbf16>
    %71 = vector.extract_strided_slice %65 {offsets = [0, 0], sizes = [5, 8], strides = [1, 1]} : vector<5x32xf32> to vector<5x8xf32>
    %72 = arith.truncf %71 : vector<5x8xf32> to vector<5x8xbf16>
    "tpu.trace_start"() <{level = 10 : i32, message = "qd,kd->qk"}> : () -> ()
    %cst_32 = arith.constant dense<0.000000e+00> : vector<5x5xf32>
    %73 = tpu.matmul %68, %70, %cst_32 {dimension_numbers = #tpu.dot_dimension_numbers<[1], [1], [0], [0], [0, 0, 1, 0], [], []>} : vector<5x8xbf16>, vector<5x8xbf16>, vector<5x5xf32> -> vector<5x5xf32>
    "tpu.trace_stop"() : () -> ()
    %cst_33 = arith.constant dense<0xFF800000> : vector<5xf32>
    %74 = vector.multi_reduction <maximumf>, %73, %cst_33 [1] : vector<5x5xf32> to vector<5xf32>
    %75 = vector.shape_cast %74 : vector<5xf32> to vector<5x1xf32>
    %76 = vector.broadcast %75 : vector<5x1xf32> to vector<5x5xf32>
    %77 = arith.subf %73, %76 : vector<5x5xf32>
    %78 = math.exp %77 : vector<5x5xf32>
    %cst_34 = arith.constant dense<0.000000e+00> : vector<5xf32>
    %79 = vector.multi_reduction <add>, %78, %cst_34 [1] : vector<5x5xf32> to vector<5xf32>
    %80 = vector.shape_cast %79 : vector<5xf32> to vector<5x1xf32>
    %81 = tpu.reciprocal %80 {approx = true} : vector<5x1xf32> -> vector<5x1xf32>
    %82 = vector.broadcast %81 : vector<5x1xf32> to vector<5x5xf32>
    %83 = arith.mulf %78, %82 : vector<5x5xf32>
    %84 = arith.truncf %83 : vector<5x5xf32> to vector<5x5xbf16>
    "tpu.trace_start"() <{level = 10 : i32, message = "qk,kd->qd"}> : () -> ()
    %cst_35 = arith.constant dense<0.000000e+00> : vector<5x8xf32>
    %85 = tpu.matmul %84, %72, %cst_35 {dimension_numbers = #tpu.dot_dimension_numbers<[1], [0], [0], [1], [0, 0, 1, 1], [], []>} : vector<5x5xbf16>, vector<5x8xbf16>, vector<5x8xf32> -> vector<5x8xf32>
    "tpu.trace_stop"() : () -> ()
    %86 = arith.truncf %85 : vector<5x8xf32> to vector<5x8xbf16>
    %87 = vector.extract_strided_slice %66 {offsets = [0, 0], sizes = [8, 32], strides = [1, 1]} : vector<32x32xbf16> to vector<8x32xbf16>
    %cst_36 = arith.constant dense<0.000000e+00> : vector<5x32xf32>
    %88 = tpu.matmul %86, %87, %cst_36 {dimension_numbers = #tpu.dot_dimension_numbers<[1], [0], [0], [1], [0, 0, 1, 1], [], []>} : vector<5x8xbf16>, vector<8x32xbf16>, vector<5x32xf32> -> vector<5x32xf32>
    %89 = vector.extract_strided_slice %63 {offsets = [0, 8], sizes = [5, 8], strides = [1, 1]} : vector<5x32xf32> to vector<5x8xf32>
    %90 = arith.truncf %89 : vector<5x8xf32> to vector<5x8xbf16>
    %91 = vector.extract_strided_slice %64 {offsets = [0, 8], sizes = [5, 8], strides = [1, 1]} : vector<5x32xf32> to vector<5x8xf32>
    %92 = arith.truncf %91 : vector<5x8xf32> to vector<5x8xbf16>
    %93 = vector.extract_strided_slice %65 {offsets = [0, 8], sizes = [5, 8], strides = [1, 1]} : vector<5x32xf32> to vector<5x8xf32>
    %94 = arith.truncf %93 : vector<5x8xf32> to vector<5x8xbf16>
    "tpu.trace_start"() <{level = 10 : i32, message = "qd,kd->qk"}> : () -> ()
    %cst_37 = arith.constant dense<0.000000e+00> : vector<5x5xf32>
    %95 = tpu.matmul %90, %92, %cst_37 {dimension_numbers = #tpu.dot_dimension_numbers<[1], [1], [0], [0], [0, 0, 1, 0], [], []>} : vector<5x8xbf16>, vector<5x8xbf16>, vector<5x5xf32> -> vector<5x5xf32>
    "tpu.trace_stop"() : () -> ()
    %cst_38 = arith.constant dense<0xFF800000> : vector<5xf32>
    %96 = vector.multi_reduction <maximumf>, %95, %cst_38 [1] : vector<5x5xf32> to vector<5xf32>
    %97 = vector.shape_cast %96 : vector<5xf32> to vector<5x1xf32>
    %98 = vector.broadcast %97 : vector<5x1xf32> to vector<5x5xf32>
    %99 = arith.subf %95, %98 : vector<5x5xf32>
    %100 = math.exp %99 : vector<5x5xf32>
    %cst_39 = arith.constant dense<0.000000e+00> : vector<5xf32>
    %101 = vector.multi_reduction <add>, %100, %cst_39 [1] : vector<5x5xf32> to vector<5xf32>
    %102 = vector.shape_cast %101 : vector<5xf32> to vector<5x1xf32>
    %103 = tpu.reciprocal %102 {approx = true} : vector<5x1xf32> -> vector<5x1xf32>
    %104 = vector.broadcast %103 : vector<5x1xf32> to vector<5x5xf32>
    %105 = arith.mulf %100, %104 : vector<5x5xf32>
    %106 = arith.truncf %105 : vector<5x5xf32> to vector<5x5xbf16>
    "tpu.trace_start"() <{level = 10 : i32, message = "qk,kd->qd"}> : () -> ()
    %cst_40 = arith.constant dense<0.000000e+00> : vector<5x8xf32>
    %107 = tpu.matmul %106, %94, %cst_40 {dimension_numbers = #tpu.dot_dimension_numbers<[1], [0], [0], [1], [0, 0, 1, 1], [], []>} : vector<5x5xbf16>, vector<5x8xbf16>, vector<5x8xf32> -> vector<5x8xf32>
    "tpu.trace_stop"() : () -> ()
    %108 = arith.truncf %107 : vector<5x8xf32> to vector<5x8xbf16>
    %109 = vector.extract_strided_slice %66 {offsets = [8, 0], sizes = [8, 32], strides = [1, 1]} : vector<32x32xbf16> to vector<8x32xbf16>
    %cst_41 = arith.constant dense<0.000000e+00> : vector<5x32xf32>
    %110 = tpu.matmul %108, %109, %cst_41 {dimension_numbers = #tpu.dot_dimension_numbers<[1], [0], [0], [1], [0, 0, 1, 1], [], []>} : vector<5x8xbf16>, vector<8x32xbf16>, vector<5x32xf32> -> vector<5x32xf32>
    %111 = arith.addf %88, %110 : vector<5x32xf32>
    %112 = vector.extract_strided_slice %63 {offsets = [0, 16], sizes = [5, 8], strides = [1, 1]} : vector<5x32xf32> to vector<5x8xf32>
    %113 = arith.truncf %112 : vector<5x8xf32> to vector<5x8xbf16>
    %114 = vector.extract_strided_slice %64 {offsets = [0, 16], sizes = [5, 8], strides = [1, 1]} : vector<5x32xf32> to vector<5x8xf32>
    %115 = arith.truncf %114 : vector<5x8xf32> to vector<5x8xbf16>
    %116 = vector.extract_strided_slice %65 {offsets = [0, 16], sizes = [5, 8], strides = [1, 1]} : vector<5x32xf32> to vector<5x8xf32>
    %117 = arith.truncf %116 : vector<5x8xf32> to vector<5x8xbf16>
    "tpu.trace_start"() <{level = 10 : i32, message = "qd,kd->qk"}> : () -> ()
    %cst_42 = arith.constant dense<0.000000e+00> : vector<5x5xf32>
    %118 = tpu.matmul %113, %115, %cst_42 {dimension_numbers = #tpu.dot_dimension_numbers<[1], [1], [0], [0], [0, 0, 1, 0], [], []>} : vector<5x8xbf16>, vector<5x8xbf16>, vector<5x5xf32> -> vector<5x5xf32>
    "tpu.trace_stop"() : () -> ()
    %cst_43 = arith.constant dense<0xFF800000> : vector<5xf32>
    %119 = vector.multi_reduction <maximumf>, %118, %cst_43 [1] : vector<5x5xf32> to vector<5xf32>
    %120 = vector.shape_cast %119 : vector<5xf32> to vector<5x1xf32>
    %121 = vector.broadcast %120 : vector<5x1xf32> to vector<5x5xf32>
    %122 = arith.subf %118, %121 : vector<5x5xf32>
    %123 = math.exp %122 : vector<5x5xf32>
    %cst_44 = arith.constant dense<0.000000e+00> : vector<5xf32>
    %124 = vector.multi_reduction <add>, %123, %cst_44 [1] : vector<5x5xf32> to vector<5xf32>
    %125 = vector.shape_cast %124 : vector<5xf32> to vector<5x1xf32>
    %126 = tpu.reciprocal %125 {approx = true} : vector<5x1xf32> -> vector<5x1xf32>
    %127 = vector.broadcast %126 : vector<5x1xf32> to vector<5x5xf32>
    %128 = arith.mulf %123, %127 : vector<5x5xf32>
    %129 = arith.truncf %128 : vector<5x5xf32> to vector<5x5xbf16>
    "tpu.trace_start"() <{level = 10 : i32, message = "qk,kd->qd"}> : () -> ()
    %cst_45 = arith.constant dense<0.000000e+00> : vector<5x8xf32>
    %130 = tpu.matmul %129, %117, %cst_45 {dimension_numbers = #tpu.dot_dimension_numbers<[1], [0], [0], [1], [0, 0, 1, 1], [], []>} : vector<5x5xbf16>, vector<5x8xbf16>, vector<5x8xf32> -> vector<5x8xf32>
    "tpu.trace_stop"() : () -> ()
    %131 = arith.truncf %130 : vector<5x8xf32> to vector<5x8xbf16>
    %132 = vector.extract_strided_slice %66 {offsets = [16, 0], sizes = [8, 32], strides = [1, 1]} : vector<32x32xbf16> to vector<8x32xbf16>
    %cst_46 = arith.constant dense<0.000000e+00> : vector<5x32xf32>
    %133 = tpu.matmul %131, %132, %cst_46 {dimension_numbers = #tpu.dot_dimension_numbers<[1], [0], [0], [1], [0, 0, 1, 1], [], []>} : vector<5x8xbf16>, vector<8x32xbf16>, vector<5x32xf32> -> vector<5x32xf32>
    %134 = arith.addf %111, %133 : vector<5x32xf32>
    %135 = vector.extract_strided_slice %63 {offsets = [0, 24], sizes = [5, 8], strides = [1, 1]} : vector<5x32xf32> to vector<5x8xf32>
    %136 = arith.truncf %135 : vector<5x8xf32> to vector<5x8xbf16>
    %137 = vector.extract_strided_slice %64 {offsets = [0, 24], sizes = [5, 8], strides = [1, 1]} : vector<5x32xf32> to vector<5x8xf32>
    %138 = arith.truncf %137 : vector<5x8xf32> to vector<5x8xbf16>
    %139 = vector.extract_strided_slice %65 {offsets = [0, 24], sizes = [5, 8], strides = [1, 1]} : vector<5x32xf32> to vector<5x8xf32>
    %140 = arith.truncf %139 : vector<5x8xf32> to vector<5x8xbf16>
    "tpu.trace_start"() <{level = 10 : i32, message = "qd,kd->qk"}> : () -> ()
    %cst_47 = arith.constant dense<0.000000e+00> : vector<5x5xf32>
    %141 = tpu.matmul %136, %138, %cst_47 {dimension_numbers = #tpu.dot_dimension_numbers<[1], [1], [0], [0], [0, 0, 1, 0], [], []>} : vector<5x8xbf16>, vector<5x8xbf16>, vector<5x5xf32> -> vector<5x5xf32>
    "tpu.trace_stop"() : () -> ()
    %cst_48 = arith.constant dense<0xFF800000> : vector<5xf32>
    %142 = vector.multi_reduction <maximumf>, %141, %cst_48 [1] : vector<5x5xf32> to vector<5xf32>
    %143 = vector.shape_cast %142 : vector<5xf32> to vector<5x1xf32>
    %144 = vector.broadcast %143 : vector<5x1xf32> to vector<5x5xf32>
    %145 = arith.subf %141, %144 : vector<5x5xf32>
    %146 = math.exp %145 : vector<5x5xf32>
    %cst_49 = arith.constant dense<0.000000e+00> : vector<5xf32>
    %147 = vector.multi_reduction <add>, %146, %cst_49 [1] : vector<5x5xf32> to vector<5xf32>
    %148 = vector.shape_cast %147 : vector<5xf32> to vector<5x1xf32>
    %149 = tpu.reciprocal %148 {approx = true} : vector<5x1xf32> -> vector<5x1xf32>
    %150 = vector.broadcast %149 : vector<5x1xf32> to vector<5x5xf32>
    %151 = arith.mulf %146, %150 : vector<5x5xf32>
    %152 = arith.truncf %151 : vector<5x5xf32> to vector<5x5xbf16>
    "tpu.trace_start"() <{level = 10 : i32, message = "qk,kd->qd"}> : () -> ()
    %cst_50 = arith.constant dense<0.000000e+00> : vector<5x8xf32>
    %153 = tpu.matmul %152, %140, %cst_50 {dimension_numbers = #tpu.dot_dimension_numbers<[1], [0], [0], [1], [0, 0, 1, 1], [], []>} : vector<5x5xbf16>, vector<5x8xbf16>, vector<5x8xf32> -> vector<5x8xf32>
    "tpu.trace_stop"() : () -> ()
    %154 = arith.truncf %153 : vector<5x8xf32> to vector<5x8xbf16>
    %155 = vector.extract_strided_slice %66 {offsets = [24, 0], sizes = [8, 32], strides = [1, 1]} : vector<32x32xbf16> to vector<8x32xbf16>
    %cst_51 = arith.constant dense<0.000000e+00> : vector<5x32xf32>
    %156 = tpu.matmul %154, %155, %cst_51 {dimension_numbers = #tpu.dot_dimension_numbers<[1], [0], [0], [1], [0, 0, 1, 1], [], []>} : vector<5x8xbf16>, vector<8x32xbf16>, vector<5x32xf32> -> vector<5x32xf32>
    %157 = arith.addf %134, %156 : vector<5x32xf32>
    %158 = arith.addf %30, %157 : vector<5x32xf32>
    %c0_52 = arith.constant 0 : index
    %c0_53 = arith.constant 0 : index
    %159 = vector.load %arg11[%c0_52, %c0_53] : memref<1x32xf32, #tpu.memory_space<vmem>>, vector<1x32xf32>
    %160 = vector.broadcast %159 : vector<1x32xf32> to vector<5x32xf32>
    %161 = arith.addf %158, %160 : vector<5x32xf32>
    %cst_54 = arith.constant dense<0.000000e+00> : vector<5xf32>
    %162 = vector.multi_reduction <add>, %161, %cst_54 [1] : vector<5x32xf32> to vector<5xf32>
    %163 = vector.shape_cast %162 : vector<5xf32> to vector<5x1xf32>
    %cst_55 = arith.constant 3.200000e+01 : f32
    %164 = vector.broadcast %cst_55 : f32 to vector<5x1xf32>
    %165 = arith.divf %163, %164 : vector<5x1xf32>
    %166 = vector.broadcast %165 : vector<5x1xf32> to vector<5x32xf32>
    %167 = arith.subf %161, %166 : vector<5x32xf32>
    %168 = arith.mulf %167, %167 : vector<5x32xf32>
    %cst_56 = arith.constant dense<0.000000e+00> : vector<5xf32>
    %169 = vector.multi_reduction <add>, %168, %cst_56 [1] : vector<5x32xf32> to vector<5xf32>
    %170 = vector.shape_cast %169 : vector<5xf32> to vector<5x1xf32>
    %cst_57 = arith.constant 3.200000e+01 : f32
    %171 = vector.broadcast %cst_57 : f32 to vector<5x1xf32>
    %172 = arith.divf %170, %171 : vector<5x1xf32>
    %173 = vector.broadcast %165 : vector<5x1xf32> to vector<5x32xf32>
    %174 = arith.subf %161, %173 : vector<5x32xf32>
    %cst_58 = arith.constant 9.99999974E-6 : f32
    %175 = vector.broadcast %cst_58 : f32 to vector<5x1xf32>
    %176 = arith.addf %172, %175 : vector<5x1xf32>
    %177 = math.rsqrt %176 : vector<5x1xf32>
    %178 = vector.broadcast %177 : vector<5x1xf32> to vector<5x32xf32>
    %179 = arith.mulf %174, %178 : vector<5x32xf32>
    %c0_59 = arith.constant 0 : index
    %c0_60 = arith.constant 0 : index
    %180 = vector.load %arg12[%c0_59, %c0_60] : memref<1x32xf32, #tpu.memory_space<vmem>>, vector<1x32xf32>
    %181 = vector.broadcast %180 : vector<1x32xf32> to vector<5x32xf32>
    %182 = arith.mulf %179, %181 : vector<5x32xf32>
    %c0_61 = arith.constant 0 : index
    %c0_62 = arith.constant 0 : index
    %183 = vector.load %arg13[%c0_61, %c0_62] : memref<1x32xf32, #tpu.memory_space<vmem>>, vector<1x32xf32>
    %184 = vector.broadcast %183 : vector<1x32xf32> to vector<5x32xf32>
    %185 = arith.addf %182, %184 : vector<5x32xf32>
    %186 = arith.truncf %185 : vector<5x32xf32> to vector<5x32xbf16>
    %c0_63 = arith.constant 0 : index
    %c0_64 = arith.constant 0 : index
    %187 = vector.load %arg14[%c0_63, %c0_64] : memref<32x128xbf16, #tpu.memory_space<vmem>>, vector<32x128xbf16>
    %cst_65 = arith.constant dense<0.000000e+00> : vector<5x128xf32>
    %188 = tpu.matmul %186, %187, %cst_65 {dimension_numbers = #tpu.dot_dimension_numbers<[1], [0], [0], [1], [0, 0, 1, 1], [], []>} : vector<5x32xbf16>, vector<32x128xbf16>, vector<5x128xf32> -> vector<5x128xf32>
    %c0_66 = arith.constant 0 : index
    %c0_67 = arith.constant 0 : index
    %189 = vector.load %arg15[%c0_66, %c0_67] : memref<1x128xf32, #tpu.memory_space<vmem>>, vector<1x128xf32>
    %190 = vector.broadcast %189 : vector<1x128xf32> to vector<5x128xf32>
    %191 = arith.addf %188, %190 : vector<5x128xf32>
    %cst_68 = arith.constant 1.702000e+00 : f32
    %192 = vector.broadcast %cst_68 : f32 to vector<5x128xf32>
    %193 = arith.mulf %192, %191 : vector<5x128xf32>
    %194 = arith.negf %193 : vector<5x128xf32>
    %195 = math.exp %194 : vector<5x128xf32>
    %cst_69 = arith.constant 1.000000e+00 : f32
    %196 = vector.broadcast %cst_69 : f32 to vector<5x128xf32>
    %197 = arith.addf %196, %195 : vector<5x128xf32>
    %198 = arith.divf %196, %197 : vector<5x128xf32>
    %199 = arith.mulf %191, %198 : vector<5x128xf32>
    %200 = arith.truncf %199 : vector<5x128xf32> to vector<5x128xbf16>
    %c0_70 = arith.constant 0 : index
    %c0_71 = arith.constant 0 : index
    %201 = vector.load %arg16[%c0_70, %c0_71] : memref<128x32xbf16, #tpu.memory_space<vmem>>, vector<128x32xbf16>
    %cst_72 = arith.constant dense<0.000000e+00> : vector<5x32xf32>
    %202 = tpu.matmul %200, %201, %cst_72 {dimension_numbers = #tpu.dot_dimension_numbers<[1], [0], [0], [1], [0, 0, 1, 1], [], []>} : vector<5x128xbf16>, vector<128x32xbf16>, vector<5x32xf32> -> vector<5x32xf32>
    %203 = arith.addf %161, %202 : vector<5x32xf32>
    %c0_73 = arith.constant 0 : index
    %c0_74 = arith.constant 0 : index
    %204 = vector.load %arg17[%c0_73, %c0_74] : memref<1x32xf32, #tpu.memory_space<vmem>>, vector<1x32xf32>
    %205 = vector.broadcast %204 : vector<1x32xf32> to vector<5x32xf32>
    %206 = arith.addf %203, %205 : vector<5x32xf32>
    %cst_75 = arith.constant dense<0.000000e+00> : vector<5xf32>
    %207 = vector.multi_reduction <add>, %206, %cst_75 [1] : vector<5x32xf32> to vector<5xf32>
    %208 = vector.shape_cast %207 : vector<5xf32> to vector<5x1xf32>
    %cst_76 = arith.constant 3.200000e+01 : f32
    %209 = vector.broadcast %cst_76 : f32 to vector<5x1xf32>
    %210 = arith.divf %208, %209 : vector<5x1xf32>
    %211 = vector.broadcast %210 : vector<5x1xf32> to vector<5x32xf32>
    %212 = arith.subf %206, %211 : vector<5x32xf32>
    %213 = arith.mulf %212, %212 : vector<5x32xf32>
    %cst_77 = arith.constant dense<0.000000e+00> : vector<5xf32>
    %214 = vector.multi_reduction <add>, %213, %cst_77 [1] : vector<5x32xf32> to vector<5xf32>
    %215 = vector.shape_cast %214 : vector<5xf32> to vector<5x1xf32>
    %cst_78 = arith.constant 3.200000e+01 : f32
    %216 = vector.broadcast %cst_78 : f32 to vector<5x1xf32>
    %217 = arith.divf %215, %216 : vector<5x1xf32>
    %218 = vector.broadcast %210 : vector<5x1xf32> to vector<5x32xf32>
    %219 = arith.subf %206, %218 : vector<5x32xf32>
    %cst_79 = arith.constant 9.99999974E-6 : f32
    %220 = vector.broadcast %cst_79 : f32 to vector<5x1xf32>
    %221 = arith.addf %217, %220 : vector<5x1xf32>
    %222 = math.rsqrt %221 : vector<5x1xf32>
    %223 = vector.broadcast %222 : vector<5x1xf32> to vector<5x32xf32>
    %224 = arith.mulf %219, %223 : vector<5x32xf32>
    %c0_80 = arith.constant 0 : index
    %c0_81 = arith.constant 0 : index
    %225 = vector.load %arg18[%c0_80, %c0_81] : memref<1x32xf32, #tpu.memory_space<vmem>>, vector<1x32xf32>
    %226 = vector.broadcast %225 : vector<1x32xf32> to vector<5x32xf32>
    %227 = arith.mulf %224, %226 : vector<5x32xf32>
    %c0_82 = arith.constant 0 : index
    %c0_83 = arith.constant 0 : index
    %228 = vector.load %arg19[%c0_82, %c0_83] : memref<1x32xf32, #tpu.memory_space<vmem>>, vector<1x32xf32>
    %229 = vector.broadcast %228 : vector<1x32xf32> to vector<5x32xf32>
    %230 = arith.addf %227, %229 : vector<5x32xf32>
    %231 = arith.truncf %230 : vector<5x32xf32> to vector<5x32xbf16>
    %c0_84 = arith.constant 0 : index
    %c0_85 = arith.constant 0 : index
    %232 = vector.load %arg20[%c0_84, %c0_85] : memref<32x96xbf16, #tpu.memory_space<vmem>>, vector<32x96xbf16>
    %cst_86 = arith.constant dense<0.000000e+00> : vector<5x96xf32>
    %233 = tpu.matmul %231, %232, %cst_86 {dimension_numbers = #tpu.dot_dimension_numbers<[1], [0], [0], [1], [0, 0, 1, 1], [], []>} : vector<5x32xbf16>, vector<32x96xbf16>, vector<5x96xf32> -> vector<5x96xf32>
    %c0_87 = arith.constant 0 : index
    %c0_88 = arith.constant 0 : index
    %234 = vector.load %arg21[%c0_87, %c0_88] : memref<1x96xf32, #tpu.memory_space<vmem>>, vector<1x96xf32>
    %235 = vector.broadcast %234 : vector<1x96xf32> to vector<5x96xf32>
    %236 = arith.addf %233, %235 : vector<5x96xf32>
    %237 = vector.extract_strided_slice %236 {offsets = [0, 0], sizes = [5, 32], strides = [1, 1]} : vector<5x96xf32> to vector<5x32xf32>
    %cst_89 = arith.constant 0.353553385 : f32
    %238 = vector.broadcast %cst_89 : f32 to vector<5x32xf32>
    %239 = arith.mulf %237, %238 : vector<5x32xf32>
    %240 = vector.extract_strided_slice %236 {offsets = [0, 32], sizes = [5, 32], strides = [1, 1]} : vector<5x96xf32> to vector<5x32xf32>
    %241 = vector.extract_strided_slice %236 {offsets = [0, 64], sizes = [5, 32], strides = [1, 1]} : vector<5x96xf32> to vector<5x32xf32>
    %c0_90 = arith.constant 0 : index
    %c0_91 = arith.constant 0 : index
    %242 = vector.load %arg22[%c0_90, %c0_91] : memref<32x32xbf16, #tpu.memory_space<vmem>>, vector<32x32xbf16>
    %243 = vector.extract_strided_slice %239 {offsets = [0, 0], sizes = [5, 8], strides = [1, 1]} : vector<5x32xf32> to vector<5x8xf32>
    %244 = arith.truncf %243 : vector<5x8xf32> to vector<5x8xbf16>
    %245 = vector.extract_strided_slice %240 {offsets = [0, 0], sizes = [5, 8], strides = [1, 1]} : vector<5x32xf32> to vector<5x8xf32>
    %246 = arith.truncf %245 : vector<5x8xf32> to vector<5x8xbf16>
    %247 = vector.extract_strided_slice %241 {offsets = [0, 0], sizes = [5, 8], strides = [1, 1]} : vector<5x32xf32> to vector<5x8xf32>
    %248 = arith.truncf %247 : vector<5x8xf32> to vector<5x8xbf16>
    "tpu.trace_start"() <{level = 10 : i32, message = "qd,kd->qk"}> : () -> ()
    %cst_92 = arith.constant dense<0.000000e+00> : vector<5x5xf32>
    %249 = tpu.matmul %244, %246, %cst_92 {dimension_numbers = #tpu.dot_dimension_numbers<[1], [1], [0], [0], [0, 0, 1, 0], [], []>} : vector<5x8xbf16>, vector<5x8xbf16>, vector<5x5xf32> -> vector<5x5xf32>
    "tpu.trace_stop"() : () -> ()
    %cst_93 = arith.constant dense<0xFF800000> : vector<5xf32>
    %250 = vector.multi_reduction <maximumf>, %249, %cst_93 [1] : vector<5x5xf32> to vector<5xf32>
    %251 = vector.shape_cast %250 : vector<5xf32> to vector<5x1xf32>
    %252 = vector.broadcast %251 : vector<5x1xf32> to vector<5x5xf32>
    %253 = arith.subf %249, %252 : vector<5x5xf32>
    %254 = math.exp %253 : vector<5x5xf32>
    %cst_94 = arith.constant dense<0.000000e+00> : vector<5xf32>
    %255 = vector.multi_reduction <add>, %254, %cst_94 [1] : vector<5x5xf32> to vector<5xf32>
    %256 = vector.shape_cast %255 : vector<5xf32> to vector<5x1xf32>
    %257 = tpu.reciprocal %256 {approx = true} : vector<5x1xf32> -> vector<5x1xf32>
    %258 = vector.broadcast %257 : vector<5x1xf32> to vector<5x5xf32>
    %259 = arith.mulf %254, %258 : vector<5x5xf32>
    %260 = arith.truncf %259 : vector<5x5xf32> to vector<5x5xbf16>
    "tpu.trace_start"() <{level = 10 : i32, message = "qk,kd->qd"}> : () -> ()
    %cst_95 = arith.constant dense<0.000000e+00> : vector<5x8xf32>
    %261 = tpu.matmul %260, %248, %cst_95 {dimension_numbers = #tpu.dot_dimension_numbers<[1], [0], [0], [1], [0, 0, 1, 1], [], []>} : vector<5x5xbf16>, vector<5x8xbf16>, vector<5x8xf32> -> vector<5x8xf32>
    "tpu.trace_stop"() : () -> ()
    %262 = arith.truncf %261 : vector<5x8xf32> to vector<5x8xbf16>
    %263 = vector.extract_strided_slice %242 {offsets = [0, 0], sizes = [8, 32], strides = [1, 1]} : vector<32x32xbf16> to vector<8x32xbf16>
    %cst_96 = arith.constant dense<0.000000e+00> : vector<5x32xf32>
    %264 = tpu.matmul %262, %263, %cst_96 {dimension_numbers = #tpu.dot_dimension_numbers<[1], [0], [0], [1], [0, 0, 1, 1], [], []>} : vector<5x8xbf16>, vector<8x32xbf16>, vector<5x32xf32> -> vector<5x32xf32>
    %265 = vector.extract_strided_slice %239 {offsets = [0, 8], sizes = [5, 8], strides = [1, 1]} : vector<5x32xf32> to vector<5x8xf32>
    %266 = arith.truncf %265 : vector<5x8xf32> to vector<5x8xbf16>
    %267 = vector.extract_strided_slice %240 {offsets = [0, 8], sizes = [5, 8], strides = [1, 1]} : vector<5x32xf32> to vector<5x8xf32>
    %268 = arith.truncf %267 : vector<5x8xf32> to vector<5x8xbf16>
    %269 = vector.extract_strided_slice %241 {offsets = [0, 8], sizes = [5, 8], strides = [1, 1]} : vector<5x32xf32> to vector<5x8xf32>
    %270 = arith.truncf %269 : vector<5x8xf32> to vector<5x8xbf16>
    "tpu.trace_start"() <{level = 10 : i32, message = "qd,kd->qk"}> : () -> ()
    %cst_97 = arith.constant dense<0.000000e+00> : vector<5x5xf32>
    %271 = tpu.matmul %266, %268, %cst_97 {dimension_numbers = #tpu.dot_dimension_numbers<[1], [1], [0], [0], [0, 0, 1, 0], [], []>} : vector<5x8xbf16>, vector<5x8xbf16>, vector<5x5xf32> -> vector<5x5xf32>
    "tpu.trace_stop"() : () -> ()
    %cst_98 = arith.constant dense<0xFF800000> : vector<5xf32>
    %272 = vector.multi_reduction <maximumf>, %271, %cst_98 [1] : vector<5x5xf32> to vector<5xf32>
    %273 = vector.shape_cast %272 : vector<5xf32> to vector<5x1xf32>
    %274 = vector.broadcast %273 : vector<5x1xf32> to vector<5x5xf32>
    %275 = arith.subf %271, %274 : vector<5x5xf32>
    %276 = math.exp %275 : vector<5x5xf32>
    %cst_99 = arith.constant dense<0.000000e+00> : vector<5xf32>
    %277 = vector.multi_reduction <add>, %276, %cst_99 [1] : vector<5x5xf32> to vector<5xf32>
    %278 = vector.shape_cast %277 : vector<5xf32> to vector<5x1xf32>
    %279 = tpu.reciprocal %278 {approx = true} : vector<5x1xf32> -> vector<5x1xf32>
    %280 = vector.broadcast %279 : vector<5x1xf32> to vector<5x5xf32>
    %281 = arith.mulf %276, %280 : vector<5x5xf32>
    %282 = arith.truncf %281 : vector<5x5xf32> to vector<5x5xbf16>
    "tpu.trace_start"() <{level = 10 : i32, message = "qk,kd->qd"}> : () -> ()
    %cst_100 = arith.constant dense<0.000000e+00> : vector<5x8xf32>
    %283 = tpu.matmul %282, %270, %cst_100 {dimension_numbers = #tpu.dot_dimension_numbers<[1], [0], [0], [1], [0, 0, 1, 1], [], []>} : vector<5x5xbf16>, vector<5x8xbf16>, vector<5x8xf32> -> vector<5x8xf32>
    "tpu.trace_stop"() : () -> ()
    %284 = arith.truncf %283 : vector<5x8xf32> to vector<5x8xbf16>
    %285 = vector.extract_strided_slice %242 {offsets = [8, 0], sizes = [8, 32], strides = [1, 1]} : vector<32x32xbf16> to vector<8x32xbf16>
    %cst_101 = arith.constant dense<0.000000e+00> : vector<5x32xf32>
    %286 = tpu.matmul %284, %285, %cst_101 {dimension_numbers = #tpu.dot_dimension_numbers<[1], [0], [0], [1], [0, 0, 1, 1], [], []>} : vector<5x8xbf16>, vector<8x32xbf16>, vector<5x32xf32> -> vector<5x32xf32>
    %287 = arith.addf %264, %286 : vector<5x32xf32>
    %288 = vector.extract_strided_slice %239 {offsets = [0, 16], sizes = [5, 8], strides = [1, 1]} : vector<5x32xf32> to vector<5x8xf32>
    %289 = arith.truncf %288 : vector<5x8xf32> to vector<5x8xbf16>
    %290 = vector.extract_strided_slice %240 {offsets = [0, 16], sizes = [5, 8], strides = [1, 1]} : vector<5x32xf32> to vector<5x8xf32>
    %291 = arith.truncf %290 : vector<5x8xf32> to vector<5x8xbf16>
    %292 = vector.extract_strided_slice %241 {offsets = [0, 16], sizes = [5, 8], strides = [1, 1]} : vector<5x32xf32> to vector<5x8xf32>
    %293 = arith.truncf %292 : vector<5x8xf32> to vector<5x8xbf16>
    "tpu.trace_start"() <{level = 10 : i32, message = "qd,kd->qk"}> : () -> ()
    %cst_102 = arith.constant dense<0.000000e+00> : vector<5x5xf32>
    %294 = tpu.matmul %289, %291, %cst_102 {dimension_numbers = #tpu.dot_dimension_numbers<[1], [1], [0], [0], [0, 0, 1, 0], [], []>} : vector<5x8xbf16>, vector<5x8xbf16>, vector<5x5xf32> -> vector<5x5xf32>
    "tpu.trace_stop"() : () -> ()
    %cst_103 = arith.constant dense<0xFF800000> : vector<5xf32>
    %295 = vector.multi_reduction <maximumf>, %294, %cst_103 [1] : vector<5x5xf32> to vector<5xf32>
    %296 = vector.shape_cast %295 : vector<5xf32> to vector<5x1xf32>
    %297 = vector.broadcast %296 : vector<5x1xf32> to vector<5x5xf32>
    %298 = arith.subf %294, %297 : vector<5x5xf32>
    %299 = math.exp %298 : vector<5x5xf32>
    %cst_104 = arith.constant dense<0.000000e+00> : vector<5xf32>
    %300 = vector.multi_reduction <add>, %299, %cst_104 [1] : vector<5x5xf32> to vector<5xf32>
    %301 = vector.shape_cast %300 : vector<5xf32> to vector<5x1xf32>
    %302 = tpu.reciprocal %301 {approx = true} : vector<5x1xf32> -> vector<5x1xf32>
    %303 = vector.broadcast %302 : vector<5x1xf32> to vector<5x5xf32>
    %304 = arith.mulf %299, %303 : vector<5x5xf32>
    %305 = arith.truncf %304 : vector<5x5xf32> to vector<5x5xbf16>
    "tpu.trace_start"() <{level = 10 : i32, message = "qk,kd->qd"}> : () -> ()
    %cst_105 = arith.constant dense<0.000000e+00> : vector<5x8xf32>
    %306 = tpu.matmul %305, %293, %cst_105 {dimension_numbers = #tpu.dot_dimension_numbers<[1], [0], [0], [1], [0, 0, 1, 1], [], []>} : vector<5x5xbf16>, vector<5x8xbf16>, vector<5x8xf32> -> vector<5x8xf32>
    "tpu.trace_stop"() : () -> ()
    %307 = arith.truncf %306 : vector<5x8xf32> to vector<5x8xbf16>
    %308 = vector.extract_strided_slice %242 {offsets = [16, 0], sizes = [8, 32], strides = [1, 1]} : vector<32x32xbf16> to vector<8x32xbf16>
    %cst_106 = arith.constant dense<0.000000e+00> : vector<5x32xf32>
    %309 = tpu.matmul %307, %308, %cst_106 {dimension_numbers = #tpu.dot_dimension_numbers<[1], [0], [0], [1], [0, 0, 1, 1], [], []>} : vector<5x8xbf16>, vector<8x32xbf16>, vector<5x32xf32> -> vector<5x32xf32>
    %310 = arith.addf %287, %309 : vector<5x32xf32>
    %311 = vector.extract_strided_slice %239 {offsets = [0, 24], sizes = [5, 8], strides = [1, 1]} : vector<5x32xf32> to vector<5x8xf32>
    %312 = arith.truncf %311 : vector<5x8xf32> to vector<5x8xbf16>
    %313 = vector.extract_strided_slice %240 {offsets = [0, 24], sizes = [5, 8], strides = [1, 1]} : vector<5x32xf32> to vector<5x8xf32>
    %314 = arith.truncf %313 : vector<5x8xf32> to vector<5x8xbf16>
    %315 = vector.extract_strided_slice %241 {offsets = [0, 24], sizes = [5, 8], strides = [1, 1]} : vector<5x32xf32> to vector<5x8xf32>
    %316 = arith.truncf %315 : vector<5x8xf32> to vector<5x8xbf16>
    "tpu.trace_start"() <{level = 10 : i32, message = "qd,kd->qk"}> : () -> ()
    %cst_107 = arith.constant dense<0.000000e+00> : vector<5x5xf32>
    %317 = tpu.matmul %312, %314, %cst_107 {dimension_numbers = #tpu.dot_dimension_numbers<[1], [1], [0], [0], [0, 0, 1, 0], [], []>} : vector<5x8xbf16>, vector<5x8xbf16>, vector<5x5xf32> -> vector<5x5xf32>
    "tpu.trace_stop"() : () -> ()
    %cst_108 = arith.constant dense<0xFF800000> : vector<5xf32>
    %318 = vector.multi_reduction <maximumf>, %317, %cst_108 [1] : vector<5x5xf32> to vector<5xf32>
    %319 = vector.shape_cast %318 : vector<5xf32> to vector<5x1xf32>
    %320 = vector.broadcast %319 : vector<5x1xf32> to vector<5x5xf32>
    %321 = arith.subf %317, %320 : vector<5x5xf32>
    %322 = math.exp %321 : vector<5x5xf32>
    %cst_109 = arith.constant dense<0.000000e+00> : vector<5xf32>
    %323 = vector.multi_reduction <add>, %322, %cst_109 [1] : vector<5x5xf32> to vector<5xf32>
    %324 = vector.shape_cast %323 : vector<5xf32> to vector<5x1xf32>
    %325 = tpu.reciprocal %324 {approx = true} : vector<5x1xf32> -> vector<5x1xf32>
    %326 = vector.broadcast %325 : vector<5x1xf32> to vector<5x5xf32>
    %327 = arith.mulf %322, %326 : vector<5x5xf32>
    %328 = arith.truncf %327 : vector<5x5xf32> to vector<5x5xbf16>
    "tpu.trace_start"() <{level = 10 : i32, message = "qk,kd->qd"}> : () -> ()
    %cst_110 = arith.constant dense<0.000000e+00> : vector<5x8xf32>
    %329 = tpu.matmul %328, %316, %cst_110 {dimension_numbers = #tpu.dot_dimension_numbers<[1], [0], [0], [1], [0, 0, 1, 1], [], []>} : vector<5x5xbf16>, vector<5x8xbf16>, vector<5x8xf32> -> vector<5x8xf32>
    "tpu.trace_stop"() : () -> ()
    %330 = arith.truncf %329 : vector<5x8xf32> to vector<5x8xbf16>
    %331 = vector.extract_strided_slice %242 {offsets = [24, 0], sizes = [8, 32], strides = [1, 1]} : vector<32x32xbf16> to vector<8x32xbf16>
    %cst_111 = arith.constant dense<0.000000e+00> : vector<5x32xf32>
    %332 = tpu.matmul %330, %331, %cst_111 {dimension_numbers = #tpu.dot_dimension_numbers<[1], [0], [0], [1], [0, 0, 1, 1], [], []>} : vector<5x8xbf16>, vector<8x32xbf16>, vector<5x32xf32> -> vector<5x32xf32>
    %333 = arith.addf %310, %332 : vector<5x32xf32>
    %334 = arith.addf %206, %333 : vector<5x32xf32>
    %c0_112 = arith.constant 0 : index
    %c0_113 = arith.constant 0 : index
    %335 = vector.load %arg23[%c0_112, %c0_113] : memref<1x32xf32, #tpu.memory_space<vmem>>, vector<1x32xf32>
    %336 = vector.broadcast %335 : vector<1x32xf32> to vector<5x32xf32>
    %337 = arith.addf %334, %336 : vector<5x32xf32>
    %cst_114 = arith.constant dense<0.000000e+00> : vector<5xf32>
    %338 = vector.multi_reduction <add>, %337, %cst_114 [1] : vector<5x32xf32> to vector<5xf32>
    %339 = vector.shape_cast %338 : vector<5xf32> to vector<5x1xf32>
    %cst_115 = arith.constant 3.200000e+01 : f32
    %340 = vector.broadcast %cst_115 : f32 to vector<5x1xf32>
    %341 = arith.divf %339, %340 : vector<5x1xf32>
    %342 = vector.broadcast %341 : vector<5x1xf32> to vector<5x32xf32>
    %343 = arith.subf %337, %342 : vector<5x32xf32>
    %344 = arith.mulf %343, %343 : vector<5x32xf32>
    %cst_116 = arith.constant dense<0.000000e+00> : vector<5xf32>
    %345 = vector.multi_reduction <add>, %344, %cst_116 [1] : vector<5x32xf32> to vector<5xf32>
    %346 = vector.shape_cast %345 : vector<5xf32> to vector<5x1xf32>
    %cst_117 = arith.constant 3.200000e+01 : f32
    %347 = vector.broadcast %cst_117 : f32 to vector<5x1xf32>
    %348 = arith.divf %346, %347 : vector<5x1xf32>
    %349 = vector.broadcast %341 : vector<5x1xf32> to vector<5x32xf32>
    %350 = arith.subf %337, %349 : vector<5x32xf32>
    %cst_118 = arith.constant 9.99999974E-6 : f32
    %351 = vector.broadcast %cst_118 : f32 to vector<5x1xf32>
    %352 = arith.addf %348, %351 : vector<5x1xf32>
    %353 = math.rsqrt %352 : vector<5x1xf32>
    %354 = vector.broadcast %353 : vector<5x1xf32> to vector<5x32xf32>
    %355 = arith.mulf %350, %354 : vector<5x32xf32>
    %c0_119 = arith.constant 0 : index
    %c0_120 = arith.constant 0 : index
    %356 = vector.load %arg24[%c0_119, %c0_120] : memref<1x32xf32, #tpu.memory_space<vmem>>, vector<1x32xf32>
    %357 = vector.broadcast %356 : vector<1x32xf32> to vector<5x32xf32>
    %358 = arith.mulf %355, %357 : vector<5x32xf32>
    %c0_121 = arith.constant 0 : index
    %c0_122 = arith.constant 0 : index
    %359 = vector.load %arg25[%c0_121, %c0_122] : memref<1x32xf32, #tpu.memory_space<vmem>>, vector<1x32xf32>
    %360 = vector.broadcast %359 : vector<1x32xf32> to vector<5x32xf32>
    %361 = arith.addf %358, %360 : vector<5x32xf32>
    %362 = arith.truncf %361 : vector<5x32xf32> to vector<5x32xbf16>
    %c0_123 = arith.constant 0 : index
    %c0_124 = arith.constant 0 : index
    %363 = vector.load %arg26[%c0_123, %c0_124] : memref<32x128xbf16, #tpu.memory_space<vmem>>, vector<32x128xbf16>
    %cst_125 = arith.constant dense<0.000000e+00> : vector<5x128xf32>
    %364 = tpu.matmul %362, %363, %cst_125 {dimension_numbers = #tpu.dot_dimension_numbers<[1], [0], [0], [1], [0, 0, 1, 1], [], []>} : vector<5x32xbf16>, vector<32x128xbf16>, vector<5x128xf32> -> vector<5x128xf32>
    %c0_126 = arith.constant 0 : index
    %c0_127 = arith.constant 0 : index
    %365 = vector.load %arg27[%c0_126, %c0_127] : memref<1x128xf32, #tpu.memory_space<vmem>>, vector<1x128xf32>
    %366 = vector.broadcast %365 : vector<1x128xf32> to vector<5x128xf32>
    %367 = arith.addf %364, %366 : vector<5x128xf32>
    %cst_128 = arith.constant 1.702000e+00 : f32
    %368 = vector.broadcast %cst_128 : f32 to vector<5x128xf32>
    %369 = arith.mulf %368, %367 : vector<5x128xf32>
    %370 = arith.negf %369 : vector<5x128xf32>
    %371 = math.exp %370 : vector<5x128xf32>
    %cst_129 = arith.constant 1.000000e+00 : f32
    %372 = vector.broadcast %cst_129 : f32 to vector<5x128xf32>
    %373 = arith.addf %372, %371 : vector<5x128xf32>
    %374 = arith.divf %372, %373 : vector<5x128xf32>
    %375 = arith.mulf %367, %374 : vector<5x128xf32>
    %376 = arith.truncf %375 : vector<5x128xf32> to vector<5x128xbf16>
    %c0_130 = arith.constant 0 : index
    %c0_131 = arith.constant 0 : index
    %377 = vector.load %arg28[%c0_130, %c0_131] : memref<128x32xbf16, #tpu.memory_space<vmem>>, vector<128x32xbf16>
    %cst_132 = arith.constant dense<0.000000e+00> : vector<5x32xf32>
    %378 = tpu.matmul %376, %377, %cst_132 {dimension_numbers = #tpu.dot_dimension_numbers<[1], [0], [0], [1], [0, 0, 1, 1], [], []>} : vector<5x128xbf16>, vector<128x32xbf16>, vector<5x32xf32> -> vector<5x32xf32>
    %379 = arith.addf %337, %378 : vector<5x32xf32>
    %c0_133 = arith.constant 0 : index
    %c0_134 = arith.constant 0 : index
    %380 = vector.load %arg29[%c0_133, %c0_134] : memref<1x32xf32, #tpu.memory_space<vmem>>, vector<1x32xf32>
    %381 = vector.broadcast %380 : vector<1x32xf32> to vector<5x32xf32>
    %382 = arith.addf %379, %381 : vector<5x32xf32>
    %383 = vector.extract_strided_slice %382 {offsets = [0, 0], sizes = [1, 32], strides = [1, 1]} : vector<5x32xf32> to vector<1x32xf32>
    %cst_135 = arith.constant dense<0.000000e+00> : vector<1xf32>
    %384 = vector.multi_reduction <add>, %383, %cst_135 [1] : vector<1x32xf32> to vector<1xf32>
    %385 = vector.shape_cast %384 : vector<1xf32> to vector<1x1xf32>
    %cst_136 = arith.constant 3.200000e+01 : f32
    %386 = vector.broadcast %cst_136 : f32 to vector<1x1xf32>
    %387 = arith.divf %385, %386 : vector<1x1xf32>
    %388 = vector.broadcast %387 : vector<1x1xf32> to vector<1x32xf32>
    %389 = arith.subf %383, %388 : vector<1x32xf32>
    %390 = arith.mulf %389, %389 : vector<1x32xf32>
    %cst_137 = arith.constant dense<0.000000e+00> : vector<1xf32>
    %391 = vector.multi_reduction <add>, %390, %cst_137 [1] : vector<1x32xf32> to vector<1xf32>
    %392 = vector.shape_cast %391 : vector<1xf32> to vector<1x1xf32>
    %cst_138 = arith.constant 3.200000e+01 : f32
    %393 = vector.broadcast %cst_138 : f32 to vector<1x1xf32>
    %394 = arith.divf %392, %393 : vector<1x1xf32>
    %395 = vector.broadcast %387 : vector<1x1xf32> to vector<1x32xf32>
    %396 = arith.subf %383, %395 : vector<1x32xf32>
    %cst_139 = arith.constant 9.99999974E-6 : f32
    %397 = vector.broadcast %cst_139 : f32 to vector<1x1xf32>
    %398 = arith.addf %394, %397 : vector<1x1xf32>
    %399 = math.rsqrt %398 : vector<1x1xf32>
    %400 = vector.broadcast %399 : vector<1x1xf32> to vector<1x32xf32>
    %401 = arith.mulf %396, %400 : vector<1x32xf32>
    %c0_140 = arith.constant 0 : index
    %c0_141 = arith.constant 0 : index
    %402 = vector.load %arg30[%c0_140, %c0_141] : memref<1x32xf32, #tpu.memory_space<vmem>>, vector<1x32xf32>
    %403 = arith.mulf %401, %402 : vector<1x32xf32>
    %c0_142 = arith.constant 0 : index
    %c0_143 = arith.constant 0 : index
    %404 = vector.load %arg31[%c0_142, %c0_143] : memref<1x32xf32, #tpu.memory_space<vmem>>, vector<1x32xf32>
    %405 = arith.addf %403, %404 : vector<1x32xf32>
    %406 = arith.truncf %405 : vector<1x32xf32> to vector<1x32xbf16>
    %c0_144 = arith.constant 0 : index
    %c0_145 = arith.constant 0 : index
    %407 = vector.load %arg32[%c0_144, %c0_145] : memref<32x16xbf16, #tpu.memory_space<vmem>>, vector<32x16xbf16>
    %cst_146 = arith.constant dense<0.000000e+00> : vector<1x16xf32>
    %408 = tpu.matmul %406, %407, %cst_146 {dimension_numbers = #tpu.dot_dimension_numbers<[1], [0], [0], [1], [0, 0, 1, 1], [], []>} : vector<1x32xbf16>, vector<32x16xbf16>, vector<1x16xf32> -> vector<1x16xf32>
    %c0_147 = arith.constant 0 : index
    %c0_148 = arith.constant 0 : index
    %c0_149 = arith.constant 0 : index
    %409 = vector.load %arg33[%c0_147, %c0_148, %c0_149] : memref<1x1x16xf32, #tpu.memory_space<vmem>>, vector<1x1x16xf32>
    %410 = vector.shape_cast %409 : vector<1x1x16xf32> to vector<1x16xf32>
    %411 = vector.shape_cast %408 : vector<1x16xf32> to vector<1x1x16xf32>
    tpu.vector_store %arg33[%c0_147, %c0_148, %c0_149], %411 {strides = array<i32>} : memref<1x1x16xf32, #tpu.memory_space<vmem>>, vector<1x1x16xf32>,
    return
  }
  func.func @transform_0(%arg0: i32) -> (i32, i32, i32) {
    %c0_i32 = arith.constant 0 : i32
    %c0_i32_0 = arith.constant 0 : i32
    %c0_i32_1 = arith.constant 0 : i32
    return %arg0, %c0_i32, %c0_i32_0 : i32, i32, i32
  }
  func.func @transform_1(%arg0: i32) -> (i32, i32) {
    %c0_i32 = arith.constant 0 : i32
    %c0_i32_0 = arith.constant 0 : i32
    %c0_i32_1 = arith.constant 0 : i32
    return %c0_i32, %c0_i32_0 : i32, i32
  }
  func.func @transform_2(%arg0: i32) -> (i32, i32) {
    %c0_i32 = arith.constant 0 : i32
    %c0_i32_0 = arith.constant 0 : i32
    %c0_i32_1 = arith.constant 0 : i32
    return %c0_i32, %c0_i32_0 : i32, i32
  }
  func.func @transform_3(%arg0: i32) -> (i32, i32) {
    %c0_i32 = arith.constant 0 : i32
    %c0_i32_0 = arith.constant 0 : i32
    %c0_i32_1 = arith.constant 0 : i32
    return %c0_i32, %c0_i32_0 : i32, i32
  }
  func.func @transform_4(%arg0: i32) -> (i32, i32) {
    %c0_i32 = arith.constant 0 : i32
    %c0_i32_0 = arith.constant 0 : i32
    %c0_i32_1 = arith.constant 0 : i32
    return %c0_i32, %c0_i32_0 : i32, i32
  }
  func.func @transform_5(%arg0: i32) -> (i32, i32) {
    %c0_i32 = arith.constant 0 : i32
    %c0_i32_0 = arith.constant 0 : i32
    %c0_i32_1 = arith.constant 0 : i32
    return %c0_i32, %c0_i32_0 : i32, i32
  }
  func.func @transform_6(%arg0: i32) -> (i32, i32) {
    %c0_i32 = arith.constant 0 : i32
    %c0_i32_0 = arith.constant 0 : i32
    %c0_i32_1 = arith.constant 0 : i32
    return %c0_i32, %c0_i32_0 : i32, i32
  }
  func.func @transform_7(%arg0: i32) -> (i32, i32) {
    %c0_i32 = arith.constant 0 : i32
    %c0_i32_0 = arith.constant 0 : i32
    %c0_i32_1 = arith.constant 0 : i32
    return %c0_i32, %c0_i32_0 : i32, i32
  }
  func.func @transform_8(%arg0: i32) -> (i32, i32) {
    %c0_i32 = arith.constant 0 : i32
    %c0_i32_0 = arith.constant 0 : i32
    %c0_i32_1 = arith.constant 0 : i32
    return %c0_i32, %c0_i32_0 : i32, i32
  }
  func.func @transform_9(%arg0: i32) -> (i32, i32) {
    %c0_i32 = arith.constant 0 : i32
    %c0_i32_0 = arith.constant 0 : i32
    %c0_i32_1 = arith.constant 0 : i32
    return %c0_i32, %c0_i32_0 : i32, i32
  }
  func.func @transform_10(%arg0: i32) -> (i32, i32) {
    %c0_i32 = arith.constant 0 : i32
    %c0_i32_0 = arith.constant 0 : i32
    %c0_i32_1 = arith.constant 0 : i32
    return %c0_i32, %c0_i32_0 : i32, i32
  }
  func.func @transform_11(%arg0: i32) -> (i32, i32) {
    %c0_i32 = arith.constant 0 : i32
    %c0_i32_0 = arith.constant 0 : i32
    %c0_i32_1 = arith.constant 0 : i32
    return %c0_i32, %c0_i32_0 : i32, i32
  }
  func.func @transform_12(%arg0: i32) -> (i32, i32) {
    %c0_i32 = arith.constant 0 : i32
    %c0_i32_0 = arith.constant 0 : i32
    %c0_i32_1 = arith.constant 0 : i32
    return %c0_i32, %c0_i32_0 : i32, i32
  }
  func.func @transform_13(%arg0: i32) -> (i32, i32) {
    %c0_i32 = arith.constant 0 : i32
    %c0_i32_0 = arith.constant 0 : i32
    %c0_i32_1 = arith.constant 0 : i32
    return %c0_i32, %c0_i32_0 : i32, i32
  }
  func.func @transform_14(%arg0: i32) -> (i32, i32) {
    %c0_i32 = arith.constant 0 : i32
    %c0_i32_0 = arith.constant 0 : i32
    %c0_i32_1 = arith.constant 0 : i32
    return %c0_i32, %c0_i32_0 : i32, i32
  }
  func.func @transform_15(%arg0: i32) -> (i32, i32) {
    %c0_i32 = arith.constant 0 : i32
    %c0_i32_0 = arith.constant 0 : i32
    %c0_i32_1 = arith.constant 0 : i32
    return %c0_i32, %c0_i32_0 : i32, i32
  }
  func.func @transform_16(%arg0: i32) -> (i32, i32) {
    %c0_i32 = arith.constant 0 : i32
    %c0_i32_0 = arith.constant 0 : i32
    %c0_i32_1 = arith.constant 0 : i32
    return %c0_i32, %c0_i32_0 : i32, i32
  }
  func.func @transform_17(%arg0: i32) -> (i32, i32) {
    %c0_i32 = arith.constant 0 : i32
    %c0_i32_0 = arith.constant 0 : i32
    %c0_i32_1 = arith.constant 0 : i32
    return %c0_i32, %c0_i32_0 : i32, i32
  }
  func.func @transform_18(%arg0: i32) -> (i32, i32) {
    %c0_i32 = arith.constant 0 : i32
    %c0_i32_0 = arith.constant 0 : i32
    %c0_i32_1 = arith.constant 0 : i32
    return %c0_i32, %c0_i32_0 : i32, i32
  }
  func.func @transform_19(%arg0: i32) -> (i32, i32) {
    %c0_i32 = arith.constant 0 : i32
    %c0_i32_0 = arith.constant 0 : i32
    %c0_i32_1 = arith.constant 0 : i32
    return %c0_i32, %c0_i32_0 : i32, i32
  }
  func.func @transform_20(%arg0: i32) -> (i32, i32) {
    %c0_i32 = arith.constant 0 : i32
    %c0_i32_0 = arith.constant 0 : i32
    %c0_i32_1 = arith.constant 0 : i32
    return %c0_i32, %c0_i32_0 : i32, i32
  }
  func.func @transform_21(%arg0: i32) -> (i32, i32) {
    %c0_i32 = arith.constant 0 : i32
    %c0_i32_0 = arith.constant 0 : i32
    %c0_i32_1 = arith.constant 0 : i32
    return %c0_i32, %c0_i32_0 : i32, i32
  }
  func.func @transform_22(%arg0: i32) -> (i32, i32) {
    %c0_i32 = arith.constant 0 : i32
    %c0_i32_0 = arith.constant 0 : i32
    %c0_i32_1 = arith.constant 0 : i32
    return %c0_i32, %c0_i32_0 : i32, i32
  }
  func.func @transform_23(%arg0: i32) -> (i32, i32) {
    %c0_i32 = arith.constant 0 : i32
    %c0_i32_0 = arith.constant 0 : i32
    %c0_i32_1 = arith.constant 0 : i32
    return %c0_i32, %c0_i32_0 : i32, i32
  }
  func.func @transform_24(%arg0: i32) -> (i32, i32) {
    %c0_i32 = arith.constant 0 : i32
    %c0_i32_0 = arith.constant 0 : i32
    %c0_i32_1 = arith.constant 0 : i32
    return %c0_i32, %c0_i32_0 : i32, i32
  }
  func.func @transform_25(%arg0: i32) -> (i32, i32) {
    %c0_i32 = arith.constant 0 : i32
    %c0_i32_0 = arith.constant 0 : i32
    %c0_i32_1 = arith.constant 0 : i32
    return %c0_i32, %c0_i32_0 : i32, i32
  }
  func.func @transform_26(%arg0: i32) -> (i32, i32) {
    %c0_i32 = arith.constant 0 : i32
    %c0_i32_0 = arith.constant 0 : i32
    %c0_i32_1 = arith.constant 0 : i32
    return %c0_i32, %c0_i32_0 : i32, i32
  }
  func.func @transform_27(%arg0: i32) -> (i32, i32) {
    %c0_i32 = arith.constant 0 : i32
    %c0_i32_0 = arith.constant 0 : i32
    %c0_i32_1 = arith.constant 0 : i32
    return %c0_i32, %c0_i32_0 : i32, i32
  }
  func.func @transform_28(%arg0: i32) -> (i32, i32) {
    %c0_i32 = arith.constant 0 : i32
    %c0_i32_0 = arith.constant 0 : i32
    %c0_i32_1 = arith.constant 0 : i32
    return %c0_i32, %c0_i32_0 : i32, i32
  }
  func.func @transform_29(%arg0: i32) -> (i32, i32) {
    %c0_i32 = arith.constant 0 : i32
    %c0_i32_0 = arith.constant 0 : i32
    %c0_i32_1 = arith.constant 0 : i32
    return %c0_i32, %c0_i32_0 : i32, i32
  }
  func.func @transform_30(%arg0: i32) -> (i32, i32) {
    %c0_i32 = arith.constant 0 : i32
    %c0_i32_0 = arith.constant 0 : i32
    %c0_i32_1 = arith.constant 0 : i32
    return %c0_i32, %c0_i32_0 : i32, i32
  }
  func.func @transform_31(%arg0: i32) -> (i32, i32) {
    %c0_i32 = arith.constant 0 : i32
    %c0_i32_0 = arith.constant 0 : i32
    %c0_i32_1 = arith.constant 0 : i32
    return %c0_i32, %c0_i32_0 : i32, i32
  }
  func.func @transform_32(%arg0: i32) -> (i32, i32, i32) {
    %c0_i32 = arith.constant 0 : i32
    %c0_i32_0 = arith.constant 0 : i32
    %c0_i32_1 = arith.constant 0 : i32
    return %arg0, %c0_i32, %c0_i32_0 : i32, i32, i32
  }
}

</mosaic_0001>

<bundles_post_ra>
// kernel: tpu_custom_call.1
= control target key start
LH: loop header
LB: loop body
LE: loop exit
PB: predicated region body
PF: predicated region fallthrough
CT: control target
= control target key end

     0   :  { %s4420_s6 = smov 1   ;;  %s4421_s10 = smov 2   ;;  %s5113_s0 = inlined_call_operand.smem [shape: u32[33], index: -1, kind: input, shape index: {}] }
   0x1   :  { %s4475_s5 = sld [smem:[%s5113_s0]]   ;;  %s4422_s14 = smov 3  }
   0x2   :  { %s4480_s9 = sld [smem:[%s5113_s0 + %s4420_s6]]   ;;  %s4423_s18 = smov 4  }
   0x3   :  { %s4485_s13 = sld [smem:[%s5113_s0 + %s4421_s10]]   ;;  %s4424_s22 = smov 5  }
   0x4   :  { %s4490_s17 = sld [smem:[%s5113_s0 + %s4422_s14]]   ;;  %s4425_s26 = smov 6  }
   0x5   :  { %s4495_s21 = sld [smem:[%s5113_s0 + %s4423_s18]]   ;;  %s4426_s30 = smov 7  }
   0x6   :  { %s4500_s25 = sld [smem:[%s5113_s0 + %s4424_s22]]   ;;  %s4427_s4 = smov 8  }
   0x7   :  { %5134 = sst [smem:[#allocation5_spill]] %s4475_s5  ;;  %s4428_s10 = smov 9  }
   0x8   :  { %5135 = sst [smem:[#allocation6_spill]] %s4480_s9  ;;  %s4429_s15 = smov 10  }
   0x9   :  { %s4505_s29 = sld [smem:[%s5113_s0 + %s4425_s26]]   ;;  %s4430_s20 = smov 11  }
   0xa   :  { %s4510_s3 = sld [smem:[%s5113_s0 + %s4426_s30]]   ;;  %s4431_s26 = smov 12  }
   0xb   :  { %s4515_s8 = sld [smem:[%s5113_s0 + %s4427_s4]]   ;;  %s4432_s1 = smov 13  }
   0xc   :  { %s4520_s14 = sld [smem:[%s5113_s0 + %s4428_s10]]   ;;  %s4433_s7 = smov 14  }
   0xd   :  { %s4525_s19 = sld [smem:[%s5113_s0 + %s4429_s15]]   ;;  %s4434_s15 = smov 15  }
   0xe   :  { %s4530_s24 = sld [smem:[%s5113_s0 + %s4430_s20]]   ;;  %s4435_s22 = smov 16  }
   0xf   :  { %s4535_s30 = sld [smem:[%s5113_s0 + %s4431_s26]]   ;;  %s4436_s28 = smov 17  }
  0x10   :  { %5136 = sst [smem:[#allocation7_spill]] %s4510_s3 }
  0x11   :  { %5137 = sst [smem:[#allocation8_spill]] %s4515_s8 }
  0x12   :  { %s4540_s6 = sld [smem:[%s5113_s0 + %s4432_s1]]  }
  0x13   :  { %s4545_s12 = sld [smem:[%s5113_s0 + %s4433_s7]]   ;;  %s4437_s7 = smov 18  }
  0x14   :  { %s4550_s20 = sld [smem:[%s5113_s0 + %s4434_s15]]   ;;  %s4438_s15 = smov 19  }
  0x15   :  { %s4555_s27 = sld [smem:[%s5113_s0 + %s4435_s22]]   ;;  %s4439_s22 = smov 20  }
  0x16   :  { %s4560_s4 = sld [smem:[%s5113_s0 + %s4436_s28]]   ;;  %s4440_s28 = smov 21  }
  0x18   :  { %5138 = sst [smem:[#allocation9_spill]] %s4540_s6 }
  0x19   :  { %5139 = sst [smem:[#allocation10_spill]] %s4545_s12 }
  0x1a   :  { %5140 = sst [smem:[#allocation11_spill]] %s4550_s20 }
  0x1b   :  { %5141 = sst [smem:[#allocation12_spill]] %s4555_s27 }
  0x1c   :  { %5142 = sst [smem:[#allocation13_spill]] %s4560_s4 }
  0x1d   :  { %s4565_s12 = sld [smem:[%s5113_s0 + %s4437_s7]]   ;;  %s4441_s7 = smov 22  }
  0x1e   :  { %s4570_s20 = sld [smem:[%s5113_s0 + %s4438_s15]]   ;;  %s4442_s15 = smov 23  }
  0x1f   :  { %s4575_s27 = sld [smem:[%s5113_s0 + %s4439_s22]]   ;;  %s4443_s22 = smov 24  }
  0x20   :  { %s4580_s4 = sld [smem:[%s5113_s0 + %s4440_s28]]   ;;  %s4444_s28 = smov 25  }
  0x23   :  { %5143 = sst [smem:[#allocation14_spill]] %s4565_s12 }
  0x24   :  { %5144 = sst [smem:[#allocation15_spill]] %s4570_s20 }
  0x25   :  { %5145 = sst [smem:[#allocation16_spill]] %s4575_s27 }
  0x26   :  { %5146 = sst [smem:[#allocation17_spill]] %s4580_s4 }
  0x27   :  { %s4585_s12 = sld [smem:[%s5113_s0 + %s4441_s7]]   ;;  %s4445_s7 = smov 26  }
  0x28   :  { %s4590_s20 = sld [smem:[%s5113_s0 + %s4442_s15]]   ;;  %s4446_s15 = smov 27  }
  0x29   :  { %s4595_s27 = sld [smem:[%s5113_s0 + %s4443_s22]]   ;;  %s4447_s22 = smov 28  }
  0x2a   :  { %s4600_s4 = sld [smem:[%s5113_s0 + %s4444_s28]]   ;;  %s4448_s28 = smov 29  }
  0x2d   :  { %5147 = sst [smem:[#allocation18_spill]] %s4585_s12 }
  0x2e   :  { %5148 = sst [smem:[#allocation19_spill]] %s4590_s20 }
  0x2f   :  { %5149 = sst [smem:[#allocation20_spill]] %s4595_s27 }
  0x30   :  { %5150 = sst [smem:[#allocation21_spill]] %s4600_s4 }
  0x31   :  { %s4605_s12 = sld [smem:[%s5113_s0 + %s4445_s7]]   ;;  %s4449_s7 = smov 30  }
  0x32   :  { %s4610_s20 = sld [smem:[%s5113_s0 + %s4446_s15]]   ;;  %s4450_s15 = smov 31  }
  0x33   :  { %s4615_s27 = sld [smem:[%s5113_s0 + %s4447_s22]]   ;;  %s4451_s22 = smov 32  }
  0x34   :  { %s4620_s4 = sld [smem:[%s5113_s0 + %s4448_s28]]  }
  0x37   :  { %5151 = sst [smem:[#allocation22_spill]] %s4605_s12 }
  0x38   :  { %5152 = sst [smem:[#allocation23_spill]] %s4610_s20 }
  0x39   :  { %5153 = sst [smem:[#allocation24_spill]] %s4615_s27 }
  0x3a   :  { %5154 = sst [smem:[#allocation25_spill]] %s4620_s4 }
  0x3b   :  { %s4625_s12 = sld [smem:[%s5113_s0 + %s4449_s7]]  }
  0x3c   :  { %s4630_s20 = sld [smem:[%s5113_s0 + %s4450_s15]]  }
  0x3d   :  { %s4635_s27 = sld [smem:[%s5113_s0 + %s4451_s22]]  }
  0x41   :  { %5155 = sst [smem:[#allocation26_spill]] %s4625_s12 }
  0x42   :  { %70 = vsyncpa [#allocation3], 0 }
  0x43   :  { %72 = vsyncpa [#allocation3 + $0x1], 0  ;;  %s4637_s28 = smov 0   ;;  %s4639_s1 = smov 0  }
  0x44   :  { %s4641_s2 = smov 0   ;;  %s4643_s7 = smov 0  }
  0x45 LB: > { %s5156_s6 = sld [smem:[#allocation9_spill]]  ;;  %s5157_s3 = sld [smem:[#allocation7_spill]]  ;;  %s4410_s1 = sphi %s4639_s1, %s5192_s1   ;;  %s4406_s28 = sphi %s4637_s28, %s5191_s28   ;;  %s4418_s7 = sphi %s4643_s7, %s5194_s7   ;;  %s4414_s2 = sphi %s4641_s2, %s5193_s2  }
  0x46   : > { %s4658_s0 = sadd.s32 4294967295, %s4418_s7   ;;  %s3642_s10 = sadd.s32 4294967294, %s4418_s7  }
  0x47   : > { %s4662_s11 = sadd.s32 1, %s4418_s7   ;;  %s762_s15 = sadd.s32 1, %s4414_s2 }
  0x48   : > { %s759_s16 = ssub.s32 %s4418_s7, %s4662_s11  ;;  %p772_p0 = scmp.ne.s32.totalorder %s4414_s2, %s4410_s1 }
  0x49   : > { %p760_p1 = scmp.eq.s32.totalorder %s759_s16, 0  ;;  %p773_p2 = scmp.eq.s32.totalorder %s4658_s0, 1 }
  0x4a   : > { %p778_p3 = scmp.ne.s32.totalorder %s4410_s1, %s4406_s28  ;;  %p779_p4 = scmp.eq.s32.totalorder %s3642_s10, 1 }
  0x4b   : > { %s4673_s18 = scalar_select %p760_p1, %s4414_s2, %s762_s15  }
  0x4c   : > { %p4675_p5 = por %p773_p2, %p772_p0  ;;  %p4679_p6 = por %p779_p4, %p778_p3 }
  0x4d   : > { %p3645_p7 = scmp.ge.s32.totalorder %s4418_s7, 1  ;;  %p898_p8 = scmp.lt.s32.totalorder %s4418_s7, 3 }
  0x4f   : > { %p899_p9 = pnand %p3645_p7, %p898_p8 }
  0x50   : > { %v4230_v0 = vld [vmem:[%s4485_s13 + $0x40] sm:$0xff] (!%p899_p9)   ;;  %v4234_v4 = vld [vmem:[%s4485_s13 + $0x48] sm:$0xff] (!%p899_p9)   ;;  %v4238_v8 = vld [vmem:[%s4485_s13 + $0x50] sm:$0xff] (!%p899_p9)   ;;  %p979_p10 = scmp.lt.s32.totalorder (!%p899_p9), %s4658_s0, 1  ;;  %s5160_s5 = sld [smem:[#allocation5_spill]] (!%p899_p9)  ;;  %vm1502_vm0 = vcmask (!%p899_p9), 258048  }
  0x51   : > { %902 = sbr.rel (%p899_p9) target bundleno = 9643 (0x25ab), region = 148  ;;  %v4231_v1 = vld [vmem:[%s4485_s13] sm:$0xff] (!%p899_p9)   ;;  %3773 = vmatprep.subr.bf16.mxu0 (!%p899_p9), %v4230_v0  ;;  %v4235_v5 = vld [vmem:[%s4485_s13 + $0x8] sm:$0xff] (!%p899_p9)   ;;  %v4239_v9 = vld [vmem:[%s4485_s13 + $0x10] sm:$0xff] (!%p899_p9)   ;;  %s5161_s9 = sld [smem:[#allocation6_spill]] (!%p899_p9)  ;;  %vm4453_vm1 = vmmov (!%p899_p9), 0  }
  0x52   : > { %v4232_v2 = vld [vmem:[%s4485_s13 + $0xc0] sm:$0xff] (!%p899_p9)   ;;  %3774 = vmatpush3.bf16.msra.mxu0 (!%p899_p9), %v4231_v1  ;;  %v4236_v6 = vld [vmem:[%s4485_s13 + $0xc8] sm:$0xff] (!%p899_p9)   ;;  %v4240_v10 = vld [vmem:[%s4485_s13 + $0xd0] sm:$0xff] (!%p899_p9)   ;;  %s5162_s8 = sld [smem:[#allocation8_spill]] (!%p899_p9)  ;;  %vm1586_vm2 = vcmask (!%p899_p9), 261120   ;;  %s5129_s16 = smov (!%p899_p9), 96  }
  0x53   : > { %v4233_v3 = vld [vmem:[%s4485_s13 + $0x80] sm:$0xff] (!%p899_p9)   ;;  %3795 = vmatprep.subr.bf16.mxu1 (!%p899_p9), %v4232_v2  ;;  %3775 = vmatprep.subr.bf16.mxu0 (!%p899_p9), %v4234_v4  ;;  %v4237_v7 = vld [vmem:[%s4485_s13 + $0x88] sm:$0xff] (!%p899_p9)   ;;  %v4241_v11 = vld [vmem:[%s4485_s13 + $0x90] sm:$0xff] (!%p899_p9)   ;;  %vm1640_vm3 = vcmask (!%p899_p9), 64512   ;;  %vm1687_vm4 = vcmask (!%p899_p9), 36864   ;;  %vm1706_vm5 = vcmask (!%p899_p9), 1041408  }
  0x54   : > { %3796 = vmatpush3.bf16.msra.mxu1 (!%p899_p9), %v4233_v3  ;;  %v4242_v12 = vld [vmem:[%s4485_s13 + $0x58] sm:$0xff] (!%p899_p9)   ;;  %v4246_v16 = vld [vmem:[%s4485_s13 + $0x60] sm:$0xff] (!%p899_p9)   ;;  %v4250_v20 = vld [vmem:[%s4485_s13 + $0x68] sm:$0xff] (!%p899_p9)   ;;  %vm1707_vm6 = vcmask (!%p899_p9), 1042432   ;;  %vm1702_vm7 = vcmask (!%p899_p9), 39936   ;;  %vm1869_vm8 = vcmask (!%p899_p9), 1043456  }
  0x55   : > { %3797 = vmatprep.subr.bf16.mxu1 (!%p899_p9), %v4236_v6  ;;  %v4243_v13 = vld [vmem:[%s4485_s13 + $0x18] sm:$0xff] (!%p899_p9)   ;;  %v4247_v17 = vld [vmem:[%s4485_s13 + $0x20] sm:$0xff] (!%p899_p9)   ;;  %v4251_v21 = vld [vmem:[%s4485_s13 + $0x28] sm:$0xff] (!%p899_p9)   ;;  %vm3462_vm9 = vcmask (!%p899_p9), 253952   ;;  %s5189_s4 = sld [smem:[#allocation25_spill]] (!%p899_p9)  ;;  %s5190_s12 = sld [smem:[#allocation26_spill]] (!%p899_p9) }
  0x56   : > { %3776 = vmatpush3.bf16.msra.mxu0 (!%p899_p9), %v4235_v5  ;;  %v4244_v14 = vld [vmem:[%s4485_s13 + $0xd8] sm:$0xff] (!%p899_p9)   ;;  %v4248_v18 = vld [vmem:[%s4485_s13 + $0xe0] sm:$0xff] (!%p899_p9)   ;;  %v4252_v22 = vld [vmem:[%s4485_s13 + $0xe8] sm:$0xff] (!%p899_p9)   ;;  %vm3540_vm10 = vcmask (!%p899_p9), 122880  }
  0x57   : > { %3777 = vmatprep.subr.bf16.mxu0 (!%p899_p9), %v4238_v8  ;;  %v4245_v15 = vld [vmem:[%s4485_s13 + $0x98] sm:$0xff] (!%p899_p9)   ;;  %v4249_v19 = vld [vmem:[%s4485_s13 + $0xa0] sm:$0xff] (!%p899_p9)   ;;  %v4253_v23 = vld [vmem:[%s4485_s13 + $0xa8] sm:$0xff] (!%p899_p9)  }
  0x58   : > { %3798 = vmatpush3.bf16.msra.mxu1 %v4237_v7  ;;  %s980_s26 = scalar_select %p979_p10, %s4658_s0, 1  ;;  %v4254_v24 = vld [vmem:[%s4485_s13 + $0x70] sm:$0xff]   ;;  %v4258_v28 = vld [vmem:[%s4485_s13 + $0x78] sm:$0xff]   ;;  %v4262_v36 = vld [vmem:[%s4485_s13 + $0x140] sm:$0xff]  }
  0x59   : > { %3799 = vmatprep.subr.bf16.mxu1 %v4240_v10  ;;  %v4255_v25 = vld [vmem:[%s4485_s13 + $0x30] sm:$0xff]   ;;  %v4259_v29 = vld [vmem:[%s4485_s13 + $0x38] sm:$0xff]   ;;  %v4263_v39 = vld [vmem:[%s4485_s13 + $0x100] sm:$0xff]  }
  0x5a   : > { %3778 = vmatpush3.bf16.msra.mxu0 %v4239_v9  ;;  %s4144_s10 = smul.u32 48, %s980_s26  ;;  %v4256_v26 = vld [vmem:[%s4485_s13 + $0xf0] sm:$0xff]   ;;  %v4260_v30 = vld [vmem:[%s4485_s13 + $0xf8] sm:$0xff]   ;;  %v4264_v42 = vld [vmem:[%s4485_s13 + $0x148] sm:$0xff]   ;;  %s5120_s26 = smov 88  }
  0x5b   : > { %3779 = vmatprep.subr.bf16.mxu0 %v4242_v12  ;;  %v4257_v27 = vld [vmem:[%s4485_s13 + $0xb0] sm:$0xff]   ;;  %v4261_v33 = vld [vmem:[%s4485_s13 + $0xb8] sm:$0xff]   ;;  %v4265_v43 = vld [vmem:[%s4485_s13 + $0x108] sm:$0xff]  }
  0x5c   : > { %3800 = vmatpush3.bf16.msra.mxu1 %v4241_v11  ;;  %s4717_s15 = scalar_lea.vmem %s5160_s5, %s4144_s10  ;;  %v4266_v44 = vld [vmem:[%s4485_s13 + $0x150] sm:$0xff]   ;;  %v4268_v46 = vld [vmem:[%s4485_s13 + $0x158] sm:$0xff]   ;;  %v4270_v48 = vld [vmem:[%s4485_s13 + $0x160] sm:$0xff]   ;;  %s5124_s10 = smov 64  }
  0x5d   : > { %3801 = vmatprep.subr.bf16.mxu1 %v4244_v14  ;;  %v986_v31 = vld [vmem:[%s4717_s15 + $0x8] sm:$0x1f]  ;;  %v985_v34 = vld [vmem:[%s4717_s15] sm:$0x1f]  ;;  %v988_v37 = vld [vmem:[%s4717_s15 + $0x18] sm:$0x1f] }
  0x5e   : > { %3780 = vmatpush3.bf16.msra.mxu0 %v4243_v13  ;;  %v992_v32 = vpack.c.bf16 %v986_v31, %v986_v31  ;;  %v991_v35 = vpack.c.bf16 %v985_v34, %v985_v34  ;;  %v994_v38 = vpack.c.bf16 %v988_v37, %v988_v37  ;;  %v987_v40 = vld [vmem:[%s4717_s15 + $0x10] sm:$0x1f]  ;;  %v4269_v47 = vld [vmem:[%s4485_s13 + $0x118] sm:$0xff]   ;;  %v4271_v49 = vld [vmem:[%s4485_s13 + $0x120] sm:$0xff]   ;;  %v4452_v37 = vmov 0.0   ;;  %s5170_s5 = smov 96  }
  0x5f   : > { %3781 = vmatprep.subr.bf16.mxu0 %v4246_v16  ;;  %v993_v41 = vpack.c.bf16 %v987_v40, %v987_v40  ;;  %v4267_v45 = vld [vmem:[%s4485_s13 + $0x110] sm:$0xff]   ;;  %v4272_v50 = vld [vmem:[%s4485_s13 + $0x168] sm:$0xff]   ;;  %v4276_v56 = vld [vmem:[%s4485_s13 + $0x178] sm:$0xff]  }
  0x60   : > { %3802 = vmatpush3.bf16.msra.mxu1 %v4245_v15  ;;  %1414 = vmatprep.mubr.bf16.mxu0 %v992_v32  ;;  %v990_v51 = vld [vmem:[%s4717_s15 + $0x28] sm:$0x1f]  ;;  %v4274_v54 = vld [vmem:[%s4485_s13 + $0x170] sm:$0xff]   ;;  %v4277_v57 = vld [vmem:[%s4485_s13 + $0x138] sm:$0xff]  }
  0x61   : > { %3803 = vmatprep.subr.bf16.mxu1 %v4248_v18  ;;  %1454 = vmatprep.mubr.bf16.mxu1 %v994_v38  ;;  %v4273_v52 = vld [vmem:[%s4485_s13 + $0x128] sm:$0xff]   ;;  %v996_v53 = vpack.c.bf16 %v990_v51, %v990_v51  ;;  %v4275_v55 = vld [vmem:[%s4485_s13 + $0x130] sm:$0xff]   ;;  %v989_v58 = vld [vmem:[%s4717_s15 + $0x20] sm:$0x1f]  ;;  %s5119_s15 = smov 120  }
  0x62   : > { %3782 = vmatpush3.bf16.msra.mxu0 %v4247_v17  ;;  %v995_v59 = vpack.c.bf16 %v989_v58, %v989_v58  ;;  %v1093_v61 = vld [vmem:[%s5161_s9] sm:$0x1f]  ;;  %v4279_v38 = vld [vmem:[%s5157_s3 + $0x8] sm:$0xff]  }
  0x63   : > { %3783 = vmatprep.subr.bf16.mxu0 %v4250_v20 }
  0x64   : > { %3804 = vmatpush3.bf16.msra.mxu1 %v4249_v19 }
  0x65   : > { %3805 = vmatprep.subr.bf16.mxu1 %v4252_v22 }
  0x66   : > { %3784 = vmatpush3.bf16.msra.mxu0 %v4251_v21 }
  0x67   : > { %3785 = vmatprep.subr.bf16.mxu0 %v4254_v24 }
  0x68   : > { %3806 = vmatpush3.bf16.msra.mxu1 %v4253_v23 }
  0x69   : > { %3807 = vmatprep.subr.bf16.mxu1 %v4256_v26 }
  0x6a   : > { %3786 = vmatpush3.bf16.msra.mxu0 %v4255_v25  ;;  %v3695_v25 = vld [vmem:[%s4490_s17] ss:$0 sm:$0xff] }
  0x6b   : > { %3787 = vmatprep.subr.bf16.mxu0 %v4258_v28 }
  0x6c   : > { %3808 = vmatpush3.bf16.msra.mxu1 %v4257_v27  ;;  %v3696_v27 = vld [vmem:[%s4495_s21] ss:$0 sm:$0xff] }
  0x6d   : > { %3809 = vmatprep.subr.bf16.mxu1 %v4260_v30 }
  0x6e   : > { %3788 = vmatpush3.bf16.msra.mxu0 %v4259_v29 }
  0x6f   : > { %3817 = vmatprep.subr.bf16.mxu0 %v4262_v36  ;;  %v4278_v36 = vld [vmem:[%s5157_s3] sm:$0xff]   ;;  %s5169_s3 = sld [smem:[#allocation16_spill]] }
  0x70   : > { %3810 = vmatpush3.bf16.msra.mxu1 %v4261_v33 }
  0x71   : > { %1415 = vmatmul.mubr.bf16.vlgmr.msra.gmra.mrb[0].mxu0 %v991_v35  ;;  %3920 = vmatprep.subr.bf16.mxu1 %v4452_v37 }
  0x72   : > { %3818 = vmatpush3.bf16.msra.mxu0 %v4263_v39  ;;  %1494 = vmatprep.mubr.bf16.mxu0 %v996_v53 }
  0x73   : > { %1455 = vmatmul.mubr.bf16.vlgmr.msra.gmra.mrb[0].mxu1 %v993_v41  ;;  %3819 = vmatprep.subr.bf16.mxu0 %v4264_v42 }
  0x74   : > { %3924 = vmatprep.mubr.msk.bf16.mxu1 %vm4453_vm1, %v4452_v37  ;;  %3921 = vmatpush3.bf16.msra.mxu1 %v4278_v36 }
  0x75   : > { %3922 = vmatprep.subr.bf16.mxu1 %v4452_v37 }
  0x76   : > { %3820 = vmatpush3.bf16.msra.mxu0 %v4265_v43  ;;  %v3697_v43 = vld [vmem:[%s4500_s25] ss:$0 sm:$0xff] }
  0x77   : > { %3821 = vmatprep.subr.bf16.mxu0 %v4266_v44 }
  0x78   : > { %3923 = vmatpush3.bf16.msra.mxu1 %v4279_v38 }
  0x79   : > { %3928 = vmatprep.subr.bf16.mxu1 %v4452_v37 }
  0x7a   : > { %3822 = vmatpush3.bf16.msra.mxu0 %v4267_v45  ;;  %v3698_v45 = vld [vmem:[%s4505_s29] ss:$0 sm:$0xff] }
  0x7b   : > { %3823 = vmatprep.subr.bf16.mxu0 %v4268_v46 }
  0x7e   : > { %3824 = vmatpush3.bf16.msra.mxu0 %v4269_v47 }
  0x7f   : > { %3825 = vmatprep.subr.bf16.mxu0 %v4270_v48 }
  0x82   : > { %3826 = vmatpush3.bf16.msra.mxu0 %v4271_v49  ;;  %v3699_v49 = vld [vmem:[%s5162_s8] ss:$0 sm:$0xff] }
  0x83   : > { %3827 = vmatprep.subr.bf16.mxu0 %v4272_v50 }
  0x86   : > { %3828 = vmatpush3.bf16.msra.mxu0 %v4273_v52 }
  0x87   : > { %3829 = vmatprep.subr.bf16.mxu0 %v4274_v54 }
  0x8a   : > { %3830 = vmatpush3.bf16.msra.mxu0 %v4275_v55 }
  0x8b   : > { %3831 = vmatprep.subr.bf16.mxu0 %v4276_v56 }
  0x8e   : > { %3832 = vmatpush3.bf16.msra.mxu0 %v4277_v57 }
  0x8f   : > { %3958 = vmatprep.subr.bf16.mxu0 %v4452_v37 }
  0x91   : > { %1495 = vmatmul.mubr.bf16.vlgmr.msra.gmra.mrb[4].mxu0 %v995_v59 }
  0x92   : > { %3960 = vmatprep.mubr.msk.bf16.mxu0 %vm4453_vm1, %v4452_v37 }
 0x144   : > { %v3789_v60 = vpop.f32.mrb[0].mxu0 }
 0x145   : > { %v3790_v62 = vpop.f32.mrb[1].mxu0 }
 0x146   : > { %v3791_v63 = vadd.f32 %v3790_v62, %v3789_v60  ;;  %v3792_v0 = vpop.f32.mrb[2].mxu0  ;;  %v3811_v1 = vpop.f32.mrb[0].mxu1 }
 0x147   : > { %v3793_v2 = vpop.f32.mrb[3].mxu0  ;;  %v3812_v4 = vpop.f32.mrb[1].mxu1 }
 0x148   : > { %v1417_v3 = vadd.f32 %v3791_v63, %v1093_v61  ;;  %v3813_v5 = vadd.f32 %v3812_v4, %v3811_v1  ;;  %v3814_v6 = vpop.f32.mrb[2].mxu1 }
 0x149   : > { %v3815_v7 = vpop.f32.mrb[3].mxu1  ;;  %v4458_v6 = vmov 65535  }
 0x14a   : > { %v1457_v8 = vadd.f32 %v3813_v5, %v1417_v3  ;;  %v1708_v7 = vsel %vm1706_vm5, 4294967295, %v4458_v6 }
 0x164   : > { %v3833_v9 = vpop.f32.mrb[4].mxu0 }
 0x165   : > { %v3834_v10 = vpop.f32.mrb[5].mxu0 }
 0x166   : > { %v3835_v11 = vadd.f32 %v3834_v10, %v3833_v9  ;;  %v3836_v12 = vpop.f32.mrb[6].mxu0  ;;  %v4791_v9 = vsel %vm1707_vm6, %v1708_v7, 0 }
 0x167   : > { %v3837_v13 = vpop.f32.mrb[7].mxu0 }
 0x168   : > { %v1497_v14 = vadd.f32 %v3835_v11, %v1457_v8 }
 0x16a   : > { %v1503_v15 = vsel %vm1502_vm0, %v1497_v14, 0.0 }
 0x16b   : > { %1504 = vadd.xlane.f32.xlu0 %v1503_v15 }
 0x1f8   : > { %v1505_v16 = vpop.xlane.xlu0 %1504 }
 0x1f9   : > { %v1507_v17 = vmul.f32 0.03125, %v1505_v16 }
 0x1fb   : > { %v1508_v18 = vsub.f32 %v1497_v14, %v1507_v17 }
 0x1fd   : > { %v1509_v19 = vmul.f32 %v1508_v18, %v1508_v18 }
 0x1ff   : > { %v1510_v20 = vsel %vm1502_vm0, %v1509_v19, 0.0 }
 0x200   : > { %1511 = vadd.xlane.f32.xlu0 %v1510_v20 }
 0x28d   : > { %v1512_v21 = vpop.xlane.xlu0 %1511 }
 0x28e   : > { %v1513_v22 = vmul.f32 0.03125, %v1512_v21 }
 0x290   : > { %v1514_v23 = vadd.f32 1e-05, %v1513_v22 }
 0x292   : > { %4304 = vrsqrt.f32 %v1514_v23 }
 0x29c   : > { %v4305_v24 = vpop.eup %4304 }
 0x29d   : > { %v1516_v26 = vmul.f32 %v4305_v24, %v1508_v18  ;;  %v1631_v18 = vld [vmem:[%s4520_s14] sm:$0xf] }
 0x29e   : > { %v1917_v19 = vsel %vm1869_vm8, %v1631_v18, 0 }
 0x29f   : > { %v1524_v28 = vmul.f32 %v3695_v25, %v1516_v26  ;;  %3959 = vmatpush3.bf16.msra.mxu0 %v1917_v19  ;;  %v1633_v19 = vld [vmem:[%s4520_s14 + $0x8] sm:$0xf] }
 0x2a0   : > { %3970 = vmatprep.subr.bf16.mxu0 %v4452_v37 }
 0x2a1   : > { %v4749_v29 = vadd.f32 %v3696_v27, %v1524_v28 }
 0x2a3   : > { %v1533_v30 = vsel %vm1502_vm0, %v4749_v29, 0.0 }
 0x2a4   : > { %1534 = vadd.xlane.f32.xlu1 %v1533_v30 }
 0x331   : > { %v1535_v31 = vpop.xlane.xlu1 %1534 }
 0x332   : > { %v1536_v32 = vmul.f32 0.03125, %v1535_v31 }
 0x334   : > { %v1537_v33 = vsub.f32 %v4749_v29, %v1536_v32 }
 0x336   : > { %v1538_v34 = vmul.f32 %v1537_v33, %v1537_v33 }
 0x338   : > { %v1539_v35 = vsel %vm1502_vm0, %v1538_v34, 0.0 }
 0x339   : > { %1540 = vadd.xlane.f32.xlu1 %v1539_v35 }
 0x3c6   : > { %v1541_v39 = vpop.xlane.xlu1 %1540 }
 0x3c7   : > { %v1542_v40 = vmul.f32 0.03125, %v1541_v39 }
 0x3c9   : > { %v1543_v41 = vadd.f32 1e-05, %v1542_v40 }
 0x3cb   : > { %4306 = vrsqrt.f32 %v1543_v41 }
 0x3d5   : > { %v4307_v42 = vpop.eup %4306 }
 0x3d6   : > { %v1545_v44 = vmul.f32 %v4307_v42, %v1537_v33 }
 0x3d8   : > { %v1553_v46 = vmul.f32 %v3697_v43, %v1545_v44 }
 0x3da   : > { %v1561_v47 = vadd.f32 %v3698_v45, %v1553_v46  ;;  %v1632_v45 = vld [vmem:[%s4520_s14 + $0x4] sm:$0xf] }
 0x3dc   : > { %v1562_v48 = vpack.c.bf16 %v1561_v47, %v1561_v47 }
 0x3de   : > { %3925 = vmatmul.mubr.msk.bf16.vlgmr.msra.gmra.mrb[4].mxu1 %vm1586_vm2, %v1562_v48  ;;  %v1871_v48 = vsel %vm1869_vm8, %v1632_v45, 0 }
 0x3df   : > { %3930 = vmatprep.mubr.msk.bf16.mxu1 %vm4453_vm1, %v4452_v37 }
 0x4b1   : > { %v1624_v50 = vpop.f32.mrb[4].mxu1 }
 0x4b2   : > { %v1625_v51 = vadd.f32 %v3699_v49, %v1624_v50  ;;  %v3926_v52 = vpop.f32.mrb[5].mxu1 }
 0x4b3   : > { %v1627_v53 = vpop.f32.mrb[6].mxu1 }
 0x4b4   : > { %v4771_v54 = vpack.c.bf16 %v1625_v51, %v1625_v51  ;;  %v3927_v55 = vpop.f32.mrb[7].mxu1  ;;  %v1630_v58 = vmul.f32 0.35355338, %v1625_v51 }
 0x4b6   : > { %1638 = vrot.lane.b32.xlu0 %v4771_v54, %s5129_s16  ;;  %v4779_v59 = vpack.c.bf16 %v1630_v58, %v1630_v58  ;;  %s5167_s16 = sld [smem:[#allocation13_spill]] }
 0x4ba   : > { %1757 = vrot.lane.b32.xlu0 %v4771_v54, %s5120_s26  ;;  %s5122_s26 = smov 112  }
 0x528   : > { %v1639_v56 = vpop.permute.xlu0 %1638 }
 0x529   : > { %v1645_v57 = vsel %vm1640_vm3, %v1639_v56, 0 }
 0x52a   : > { %3929 = vmatpush3.bf16.xpose.msra.mxu1 %v1645_v57 }
 0x52b   : > { %3934 = vmatprep.subr.bf16.mxu1 %v4452_v37 }
 0x52c   : > { %v1758_v14 = vpop.permute.xlu0 %1757 }
 0x52d   : > { %v1763_v16 = vsel %vm1640_vm3, %v1758_v14, 0 }
 0x531   : > { %3931 = vmatmul.mubr.msk.bf16.vlgmr.msra.gmra.mrb[8].mxu1 %vm1640_vm3, %v4779_v59 }
 0x532   : > { %3936 = vmatprep.mubr.msk.bf16.mxu1 %vm4453_vm1, %v4452_v37 }
 0x604   : > { %v1681_v60 = vpop.f32.mrb[8].mxu1 }
 0x605   : > { %v3932_v61 = vpop.f32.mrb[9].mxu1  ;;  %v1688_v62 = vsel %vm1687_vm4, %v1681_v60, -inf }
 0x606   : > { %1689 = vmax.xlane.f32.xlu1 %v1688_v62  ;;  %v1684_v63 = vpop.f32.mrb[10].mxu1 }
 0x607   : > { %v3933_v0 = vpop.f32.mrb[11].mxu1 }
 0x693   : > { %v1690_v1 = vpop.xlane.xlu1 %1689 }
 0x694   : > { %v1691_v2 = vsub.f32 %v1681_v60, %v1690_v1 }
 0x696   : > { %v1692_v3 = vmul.f32 1.442695, %v1691_v2 }
 0x698   : > { %4308 = vpow2.f32 %v1692_v3 }
 0x6a2   : > { %v4309_v4 = vpop.eup %4308 }
 0x6a3   : > { %v1694_v5 = vsel %vm1687_vm4, %v4309_v4, 0.0 }
 0x6a4   : > { %1695 = vadd.xlane.f32.xlu1 %v1694_v5 }
 0x6b5   : > { %1700 = vrot.lane.b32.xlu1 %v4771_v54, %s5124_s10  ;;  %s5128_s10 = smov 48  }
 0x6b9   : > { %1755 = vrot.lane.b32.xlu1 %v4779_v59, %s5119_s15  ;;  %s5121_s15 = smov 56  }
 0x731   : > { %v1696_v8 = vpop.xlane.xlu1 %1695 }
 0x732   : > { %4310 = vrcp.f32 %v1696_v8 }
 0x735   : > { %v1701_v10 = vpop.permute.xlu1 %1700 }
 0x736   : > { %v1711_v11 = vand.u32 %v4791_v9, %v1701_v10 }
 0x738   : > { %3935 = vmatpush3.bf16.msra.mxu1 %v1711_v11 }
 0x739   : > { %3940 = vmatprep.subr.bf16.mxu1 %v4452_v37  ;;  %v1756_v17 = vpop.permute.xlu1 %1755 }
 0x73c   : > { %v4311_v12 = vpop.eup %4310 }
 0x73d   : > { %v1698_v13 = vmul.f32 %v4311_v12, %v4309_v4 }
 0x73f   : > { %v1699_v15 = vpack.c.bf16 %v1698_v13, %v1698_v13 }
 0x741   : > { %3937 = vmatmul.mubr.msk.bf16.vlgmr.msra.gmra.mrb[12].mxu1 %vm1702_vm7, %v1699_v15 }
 0x742   : > { %3941 = vmatpush3.bf16.xpose.msra.mxu1 %v1763_v16  ;;  %3942 = vmatprep.mubr.msk.bf16.mxu1 %vm4453_vm1, %v4452_v37 }
 0x743   : > { %3946 = vmatprep.subr.bf16.mxu1 %v4452_v37 }
 0x749   : > { %3943 = vmatmul.mubr.msk.bf16.vlgmr.msra.gmra.mrb[16].mxu1 %vm1640_vm3, %v1756_v17 }
 0x74a   : > { %3948 = vmatprep.mubr.msk.bf16.mxu1 %vm4453_vm1, %v4452_v37 }
 0x814   : > { %v1747_v20 = vpop.f32.mrb[12].mxu1 }
 0x815   : > { %v1753_v21 = vpack.c.bf16 %v1747_v20, %v1747_v20  ;;  %v3938_v22 = vpop.f32.mrb[13].mxu1  ;;  %v2074_v20 = vsel %vm1869_vm8, %v1633_v19, 0 }
 0x816   : > { %v1750_v23 = vpop.f32.mrb[14].mxu1 }
 0x817   : > { %v3939_v24 = vpop.f32.mrb[15].mxu1  ;;  %3961 = vmatmul.mubr.msk.bf16.vlgmr.msra.gmra.mrb[8].mxu0 %vm1640_vm3, %v1753_v21 }
 0x818   : > { %3972 = vmatprep.mubr.msk.bf16.mxu0 %vm4453_vm1, %v4452_v37 }
 0x81c   : > { %v1799_v25 = vpop.f32.mrb[16].mxu1 }
 0x81d   : > { %v3944_v26 = vpop.f32.mrb[17].mxu1  ;;  %v1805_v27 = vsel %vm1687_vm4, %v1799_v25, -inf }
 0x81e   : > { %1806 = vmax.xlane.f32.xlu0 %v1805_v27  ;;  %v1802_v28 = vpop.f32.mrb[18].mxu1 }
 0x81f   : > { %v3945_v30 = vpop.f32.mrb[19].mxu1 }
 0x834   : > { %1817 = vrot.lane.b32.xlu0 %v4771_v54, %s5121_s15  ;;  %s5123_s15 = smov 80  }
 0x838   : > { %1959 = vrot.lane.b32.xlu0 %v4779_v59, %s5122_s26  ;;  %s5127_s26 = smov 72  }
 0x8ab   : > { %v1807_v31 = vpop.xlane.xlu0 %1806 }
 0x8ac   : > { %v1808_v32 = vsub.f32 %v1799_v25, %v1807_v31 }
 0x8ae   : > { %v1809_v33 = vmul.f32 1.442695, %v1808_v32 }
 0x8af   : > { %v1818_v34 = vpop.permute.xlu0 %1817 }
 0x8b0   : > { %4312 = vpow2.f32 %v1809_v33  ;;  %v1823_v35 = vand.u32 %v1818_v34, %v4791_v9 }
 0x8b2   : > { %3947 = vmatpush3.bf16.msra.mxu1 %v1823_v35 }
 0x8b3   : > { %3952 = vmatprep.subr.bf16.mxu1 %v4452_v37  ;;  %v1960_v57 = vpop.permute.xlu0 %1959 }
 0x8ba   : > { %v4313_v36 = vpop.eup %4312 }
 0x8bb   : > { %v1811_v38 = vsel %vm1687_vm4, %v4313_v36, 0.0 }
 0x8bc   : > { %1812 = vadd.xlane.f32.xlu1 %v1811_v38 }
 0x8cd   : > { %1961 = vrot.lane.b32.xlu1 %v4771_v54, %s5123_s15  ;;  %s5125_s15 = smov 104  }
 0x8ea   : > { %v1953_v39 = vpop.f32.mrb[8].mxu0 }
 0x8eb   : > { %v3962_v40 = vpop.f32.mrb[9].mxu0 }
 0x8ec   : > { %v1956_v41 = vpop.f32.mrb[10].mxu0  ;;  %v1634_v40 = vld [vmem:[%s4520_s14 + $0xc] sm:$0xf] }
 0x8ed   : > { %v3963_v42 = vpop.f32.mrb[11].mxu0  ;;  %v2232_v41 = vsel %vm1869_vm8, %v1634_v40, 0 }
 0x949   : > { %v1813_v43 = vpop.xlane.xlu1 %1812 }
 0x94a   : > { %4314 = vrcp.f32 %v1813_v43 }
 0x94d   : > { %v1962_v49 = vpop.permute.xlu1 %1961 }
 0x94e   : > { %v1967_v55 = vsel %vm1640_vm3, %v1962_v49, 0 }
 0x954   : > { %v4315_v44 = vpop.eup %4314 }
 0x955   : > { %v1815_v46 = vmul.f32 %v4315_v44, %v4313_v36 }
 0x957   : > { %v1816_v47 = vpack.c.bf16 %v1815_v46, %v1815_v46 }
 0x959   : > { %3949 = vmatmul.mubr.msk.bf16.vlgmr.msra.gmra.mrb[20].mxu1 %vm1702_vm7, %v1816_v47 }
 0x95a   : > { %3953 = vmatpush3.bf16.msra.mxu1 %v1871_v48  ;;  %3954 = vmatprep.mubr.msk.bf16.mxu1 %vm4453_vm1, %v4452_v37 }
 0x95b   : > { %3964 = vmatprep.subr.bf16.mxu1 %v4452_v37 }
 0xa2c   : > { %v1859_v50 = vpop.f32.mrb[20].mxu1 }
 0xa2d   : > { %v1865_v51 = vpack.c.bf16 %v1859_v50, %v1859_v50  ;;  %v3950_v52 = vpop.f32.mrb[21].mxu1 }
 0xa2e   : > { %v1862_v53 = vpop.f32.mrb[22].mxu1 }
 0xa2f   : > { %v3951_v56 = vpop.f32.mrb[23].mxu1  ;;  %3955 = vmatmul.mubr.msk.bf16.vlgmr.msra.gmra.mrb[24].mxu1 %vm1640_vm3, %v1865_v51 }
 0xa30   : > { %3965 = vmatpush3.bf16.xpose.msra.mxu1 %v1967_v55  ;;  %3966 = vmatprep.mubr.msk.bf16.mxu1 %vm4453_vm1, %v4452_v37 }
 0xa31   : > { %3976 = vmatprep.subr.bf16.mxu1 %v4452_v37 }
 0xa37   : > { %3967 = vmatmul.mubr.msk.bf16.vlgmr.msra.gmra.mrb[28].mxu1 %vm1640_vm3, %v1960_v57 }
 0xa38   : > { %3978 = vmatprep.mubr.msk.bf16.mxu1 %vm4453_vm1, %v4452_v37  ;;  %3977 = vmatpush3.bf16.msra.mxu1 %v2074_v20 }
 0xa39   : > { %3988 = vmatprep.subr.bf16.mxu1 %v4452_v37 }
 0xb02   : > { %v1907_v58 = vpop.f32.mrb[24].mxu1 }
 0xb03   : > { %v4833_v60 = vadd.f32 %v1953_v39, %v1907_v58  ;;  %v3956_v61 = vpop.f32.mrb[25].mxu1 }
 0xb04   : > { %v1910_v62 = vpop.f32.mrb[26].mxu1 }
 0xb05   : > { %v3957_v63 = vpop.f32.mrb[27].mxu1 }
 0xb0a   : > { %v2003_v0 = vpop.f32.mrb[28].mxu1 }
 0xb0b   : > { %v3968_v1 = vpop.f32.mrb[29].mxu1  ;;  %v2009_v2 = vsel %vm1687_vm4, %v2003_v0, -inf }
 0xb0c   : > { %2010 = vmax.xlane.f32.xlu1 %v2009_v2  ;;  %v2006_v3 = vpop.f32.mrb[30].mxu1 }
 0xb0d   : > { %v3969_v4 = vpop.f32.mrb[31].mxu1 }
 0xb1d   : > { %2119 = vrot.lane.b32.xlu1 %v4771_v54, %s5127_s26  ;;  %s5164_s26 = sld [smem:[#allocation10_spill]] }
 0xb21   : > { %2117 = vrot.lane.b32.xlu1 %v4779_v59, %s5125_s15  ;;  %s5126_s15 = smov 40  }
 0xb99   : > { %v2011_v5 = vpop.xlane.xlu1 %2010 }
 0xb9a   : > { %v2012_v6 = vsub.f32 %v2003_v0, %v2011_v5 }
 0xb9c   : > { %v2013_v7 = vmul.f32 1.442695, %v2012_v6 }
 0xb9d   : > { %v2120_v15 = vpop.permute.xlu1 %2119 }
 0xb9e   : > { %4316 = vpow2.f32 %v2013_v7  ;;  %v2125_v17 = vsel %vm1640_vm3, %v2120_v15, 0  ;;  %v4280_v7 = vld [vmem:[%s5156_s6] sm:$0xff]  }
 0xba1   : > { %v2118_v18 = vpop.permute.xlu1 %2117 }
 0xba8   : > { %v4317_v8 = vpop.eup %4316 }
 0xba9   : > { %v2015_v10 = vsel %vm1687_vm4, %v4317_v8, 0.0 }
 0xbaa   : > { %2016 = vadd.xlane.f32.xlu0 %v2015_v10 }
 0xbc0   : > { %2021 = vrot.lane.b32.xlu0 %v4771_v54, %s5128_s10  ;;  %s5165_s10 = sld [smem:[#allocation12_spill]] }
 0xc37   : > { %v2017_v11 = vpop.xlane.xlu0 %2016 }
 0xc38   : > { %4318 = vrcp.f32 %v2017_v11 }
 0xc3b   : > { %v2022_v12 = vpop.permute.xlu0 %2021 }
 0xc3c   : > { %v2027_v13 = vand.u32 %v2022_v12, %v4791_v9 }
 0xc3e   : > { %3971 = vmatpush3.bf16.msra.mxu0 %v2027_v13  ;;  %v3716_v13 = vld [vmem:[%s4530_s24] ss:$0 sm:$0xff] }
 0xc3f   : > { %3982 = vmatprep.subr.bf16.mxu0 %v4452_v37 }
 0xc42   : > { %v4319_v59 = vpop.eup %4318 }
 0xc43   : > { %v2019_v14 = vmul.f32 %v4319_v59, %v4317_v8 }
 0xc45   : > { %v2020_v16 = vpack.c.bf16 %v2019_v14, %v2019_v14  ;;  %v3717_v14 = vld [vmem:[%s4535_s30] ss:$0 sm:$0xff] }
 0xc47   : > { %3973 = vmatmul.mubr.msk.bf16.vlgmr.msra.gmra.mrb[12].mxu0 %vm1702_vm7, %v2020_v16 }
 0xc48   : > { %3983 = vmatpush3.bf16.xpose.msra.mxu0 %v2125_v17  ;;  %3984 = vmatprep.mubr.msk.bf16.mxu0 %vm4453_vm1, %v4452_v37 }
 0xc49   : > { %3994 = vmatprep.subr.bf16.mxu0 %v4452_v37 }
 0xc4f   : > { %3985 = vmatmul.mubr.msk.bf16.vlgmr.msra.gmra.mrb[16].mxu0 %vm1640_vm3, %v2118_v18 }
 0xc50   : > { %3996 = vmatprep.mubr.msk.bf16.mxu0 %vm4453_vm1, %v4452_v37  ;;  %3995 = vmatpush3.bf16.msra.mxu0 %v2232_v41 }
 0xc51   : > { %4008 = vmatprep.subr.bf16.mxu0 %v4452_v37 }
 0xd1a   : > { %v2063_v21 = vpop.f32.mrb[12].mxu0 }
 0xd1b   : > { %v2069_v22 = vpack.c.bf16 %v2063_v21, %v2063_v21  ;;  %v3974_v23 = vpop.f32.mrb[13].mxu0 }
 0xd1c   : > { %v2066_v24 = vpop.f32.mrb[14].mxu0 }
 0xd1d   : > { %v3975_v25 = vpop.f32.mrb[15].mxu0  ;;  %3979 = vmatmul.mubr.msk.bf16.vlgmr.msra.gmra.mrb[32].mxu1 %vm1640_vm3, %v2069_v22 }
 0xd1e   : > { %3990 = vmatprep.mubr.msk.bf16.mxu1 %vm4453_vm1, %v4452_v37 }
 0xd22   : > { %v2161_v26 = vpop.f32.mrb[16].mxu0 }
 0xd23   : > { %v3986_v27 = vpop.f32.mrb[17].mxu0  ;;  %v2167_v28 = vsel %vm1687_vm4, %v2161_v26, -inf }
 0xd24   : > { %2168 = vmax.xlane.f32.xlu0 %v2167_v28  ;;  %v2164_v30 = vpop.f32.mrb[18].mxu0 }
 0xd25   : > { %v3987_v31 = vpop.f32.mrb[19].mxu0 }
 0xd3a   : > { %2179 = vrot.lane.b32.xlu0 %v4771_v54, %s5126_s15  ;;  %s5163_s15 = sld [smem:[#allocation11_spill]] }
 0xd40   : > { %v4282_v18 = vld [vmem:[%s5163_s15] sm:$0xff]   ;;  %v4283_v19 = vld [vmem:[%s5163_s15 + $0x8] sm:$0xff]   ;;  %v4284_v20 = vld [vmem:[%s5163_s15 + $0x10] sm:$0xff]  }
 0xd41   : > { %v4285_v21 = vld [vmem:[%s5163_s15 + $0x18] sm:$0xff]   ;;  %v4286_v22 = vld [vmem:[%s5163_s15 + $0x20] sm:$0xff]   ;;  %v4287_v23 = vld [vmem:[%s5163_s15 + $0x28] sm:$0xff]  }
 0xd42   : > { %v4288_v24 = vld [vmem:[%s5163_s15 + $0x30] sm:$0xff]   ;;  %v4289_v25 = vld [vmem:[%s5163_s15 + $0x38] sm:$0xff]  }
 0xdb1   : > { %v2169_v32 = vpop.xlane.xlu0 %2168 }
 0xdb2   : > { %v2170_v33 = vsub.f32 %v2161_v26, %v2169_v32  ;;  %v3718_v26 = vld [vmem:[%s5164_s26] ss:$0 sm:$0xff]  ;;  %s5166_s26 = sld [smem:[#allocation15_spill]] }
 0xdb4   : > { %v2171_v34 = vmul.f32 1.442695, %v2170_v33 }
 0xdb5   : > { %v2180_v35 = vpop.permute.xlu0 %2179 }
 0xdb6   : > { %4320 = vpow2.f32 %v2171_v34  ;;  %v2185_v36 = vand.u32 %v2180_v35, %v4791_v9 }
 0xdb8   : > { %3989 = vmatpush3.bf16.msra.mxu1 %v2185_v36 }
 0xdb9   : > { %4000 = vmatprep.subr.bf16.mxu1 %v4452_v37 }
 0xdc0   : > { %v4321_v38 = vpop.eup %4320 }
 0xdc1   : > { %v2173_v39 = vsel %vm1687_vm4, %v4321_v38, 0.0 }
 0xdc2   : > { %2174 = vadd.xlane.f32.xlu1 %v2173_v39 }
 0xdf0   : > { %v2110_v54 = vpop.f32.mrb[32].mxu1 }
 0xdf1   : > { %v2116_v42 = vadd.f32 %v2110_v54, %v4833_v60  ;;  %v3980_v43 = vpop.f32.mrb[33].mxu1  ;;  %v3715_v60 = vld [vmem:[%s4525_s19] ss:$0 sm:$0xff] }
 0xdf2   : > { %v2113_v44 = vpop.f32.mrb[34].mxu1  ;;  %v3731_v54 = vld [vmem:[%s5165_s10] ss:$0 sm:$0xff]  ;;  %s5168_s10 = sld [smem:[#allocation14_spill]] }
 0xdf3   : > { %v3981_v45 = vpop.f32.mrb[35].mxu1 }
 0xe4f   : > { %v2175_v46 = vpop.xlane.xlu1 %2174 }
 0xe50   : > { %4322 = vrcp.f32 %v2175_v46 }
 0xe5a   : > { %v4323_v47 = vpop.eup %4322 }
 0xe5b   : > { %v2177_v48 = vmul.f32 %v4323_v47, %v4321_v38 }
 0xe5d   : > { %v2178_v49 = vpack.c.bf16 %v2177_v48, %v2177_v48 }
 0xe5f   : > { %3991 = vmatmul.mubr.msk.bf16.vlgmr.msra.gmra.mrb[36].mxu1 %vm1702_vm7, %v2178_v49 }
 0xe60   : > { %4004 = vmatprep.mubr.msk.bf16.mxu1 %vm4453_vm1, %v4452_v37  ;;  %4001 = vmatpush3.bf16.msra.mxu1 %v4280_v7 }
 0xe61   : > { %4002 = vmatprep.subr.bf16.mxu1 %v4452_v37 }
 0xf32   : > { %v2221_v50 = vpop.f32.mrb[36].mxu1 }
 0xf33   : > { %v2227_v51 = vpack.c.bf16 %v2221_v50, %v2221_v50  ;;  %v3992_v52 = vpop.f32.mrb[37].mxu1 }
 0xf34   : > { %v2224_v53 = vpop.f32.mrb[38].mxu1 }
 0xf35   : > { %v3993_v55 = vpop.f32.mrb[39].mxu1  ;;  %3997 = vmatmul.mubr.msk.bf16.vlgmr.msra.gmra.mrb[20].mxu0 %vm1640_vm3, %v2227_v51  ;;  %v4290_v53 = vld [vmem:[%s5166_s26] sm:$0xff]  }
 0xf36   : > { %4024 = vmatprep.mubr.msk.bf16.mxu0 %vm4453_vm1, %v4452_v37  ;;  %4009 = vmatpush3.bf16.msra.mxu0 %v4282_v18  ;;  %v4291_v55 = vld [vmem:[%s5166_s26 + $0x8] sm:$0xff]  }
 0xf37   : > { %4010 = vmatprep.subr.bf16.mxu0 %v4452_v37 }
 0xf3a   : > { %4011 = vmatpush3.bf16.msra.mxu0 %v4283_v19 }
 0xf3b   : > { %4012 = vmatprep.subr.bf16.mxu0 %v4452_v37 }
 0xf3e   : > { %4013 = vmatpush3.bf16.msra.mxu0 %v4284_v20 }
 0xf3f   : > { %4014 = vmatprep.subr.bf16.mxu0 %v4452_v37 }
 0xf42   : > { %4015 = vmatpush3.bf16.msra.mxu0 %v4285_v21 }
 0xf43   : > { %4016 = vmatprep.subr.bf16.mxu0 %v4452_v37 }
 0xf46   : > { %4017 = vmatpush3.bf16.msra.mxu0 %v4286_v22 }
 0xf47   : > { %4018 = vmatprep.subr.bf16.mxu0 %v4452_v37 }
 0xf4a   : > { %4019 = vmatpush3.bf16.msra.mxu0 %v4287_v23 }
 0xf4b   : > { %4020 = vmatprep.subr.bf16.mxu0 %v4452_v37 }
 0xf4e   : > { %4021 = vmatpush3.bf16.msra.mxu0 %v4288_v24 }
 0xf4f   : > { %4022 = vmatprep.subr.bf16.mxu0 %v4452_v37 }
 0xf52   : > { %4023 = vmatpush3.bf16.msra.mxu0 %v4289_v25 }
 0xf53   : > { %4054 = vmatprep.subr.bf16.mxu0 %v4452_v37 }
0x1008   : > { %v2268_v56 = vpop.f32.mrb[20].mxu0 }
0x1009   : > { %v2274_v57 = vadd.f32 %v2268_v56, %v2116_v42  ;;  %v3998_v58 = vpop.f32.mrb[21].mxu0 }
0x100a   : > { %v2271_v61 = vpop.f32.mrb[22].mxu0 }
0x100b   : > { %v2275_v62 = vadd.f32 %v2274_v57, %v4749_v29  ;;  %v3999_v63 = vpop.f32.mrb[23].mxu0  ;;  %v4281_v29 = vld [vmem:[%s5156_s6 + $0x8] sm:$0xff]   ;;  %v3732_v61 = vld [vmem:[%s5167_s16] ss:$0 sm:$0xff]  ;;  %s5173_s16 = smov 120   ;;  %s5185_s6 = sld [smem:[#allocation20_spill]] }
0x100c   : > { %4003 = vmatpush3.bf16.msra.mxu1 %v4281_v29  ;;  %v3733_v63 = vld [vmem:[%s5168_s10] ss:$0 sm:$0xff]  ;;  %s5174_s10 = sld [smem:[#allocation17_spill]] }
0x100d   : > { %v4877_v0 = vadd.f32 %v3715_v60, %v2275_v62  ;;  %4028 = vmatprep.subr.bf16.mxu1 %v4452_v37 }
0x100f   : > { %v2284_v1 = vsel %vm1502_vm0, %v4877_v0, 0.0 }
0x1010   : > { %2285 = vadd.xlane.f32.xlu1 %v2284_v1 }
0x109d   : > { %v2286_v2 = vpop.xlane.xlu1 %2285 }
0x109e   : > { %v2287_v3 = vmul.f32 0.03125, %v2286_v2 }
0x10a0   : > { %v2288_v4 = vsub.f32 %v4877_v0, %v2287_v3  ;;  %v3734_v3 = vld [vmem:[%s5169_s3] ss:$0 sm:$0xff]  ;;  %s5172_s3 = smov 88  }
0x10a2   : > { %v2289_v5 = vmul.f32 %v2288_v4, %v2288_v4 }
0x10a4   : > { %v2290_v6 = vsel %vm1502_vm0, %v2289_v5, 0.0 }
0x10a5   : > { %2291 = vadd.xlane.f32.xlu1 %v2290_v6 }
0x1132   : > { %v2292_v8 = vpop.xlane.xlu1 %2291 }
0x1133   : > { %v2293_v10 = vmul.f32 0.03125, %v2292_v8 }
0x1135   : > { %v2294_v11 = vadd.f32 1e-05, %v2293_v10 }
0x1137   : > { %4324 = vrsqrt.f32 %v2294_v11 }
0x1141   : > { %v4325_v12 = vpop.eup %4324 }
0x1142   : > { %v2296_v59 = vmul.f32 %v4325_v12, %v2288_v4 }
0x1144   : > { %v2304_v15 = vmul.f32 %v3716_v13, %v2296_v59 }
0x1146   : > { %v2312_v16 = vadd.f32 %v3717_v14, %v2304_v15 }
0x1148   : > { %v2313_v17 = vpack.c.bf16 %v2312_v16, %v2312_v16 }
0x114a   : > { %4005 = vmatmul.mubr.msk.bf16.vlgmr.msra.gmra.mrb[40].mxu1 %vm1586_vm2, %v2313_v17 }
0x114b   : > { %4032 = vmatprep.mubr.msk.bf16.mxu1 %vm4453_vm1, %v4452_v37  ;;  %4029 = vmatpush3.bf16.msra.mxu1 %v4290_v53 }
0x114c   : > { %4030 = vmatprep.subr.bf16.mxu1 %v4452_v37 }
0x114f   : > { %4031 = vmatpush3.bf16.msra.mxu1 %v4291_v55  ;;  %v2599_v55 = vld [vmem:[%s5174_s10] sm:$0xf] }
0x1150   : > { %4036 = vmatprep.subr.bf16.mxu1 %v4452_v37 }
0x121d   : > { %v2374_v27 = vpop.f32.mrb[40].mxu1 }
0x121e   : > { %v2375_v28 = vadd.f32 %v3718_v26, %v2374_v27  ;;  %v4006_v30 = vpop.f32.mrb[41].mxu1 }
0x121f   : > { %v2377_v31 = vpop.f32.mrb[42].mxu1 }
0x1220   : > { %v3722_v32 = vmul.f32 -1.702, %v2375_v28  ;;  %v4007_v33 = vpop.f32.mrb[43].mxu1 }
0x1222   : > { %v2382_v34 = vmul.f32 1.442695, %v3722_v32 }
0x1224   : > { %4326 = vpow2.f32 %v2382_v34 }
0x122e   : > { %v4327_v35 = vpop.eup %4326 }
0x122f   : > { %v2384_v36 = vadd.f32 1.0, %v4327_v35 }
0x1231   : > { %4328 = vrcp.f32 %v2384_v36 }
0x123b   : > { %v4329_v38 = vpop.eup %4328 }
0x123c   : > { %v2387_v39 = vmul.f32 %v4329_v38, %v2375_v28 }
0x123e   : > { %v2388_v40 = vpack.c.bf16 %v2387_v39, %v2387_v39 }
0x1240   : > { %4025 = vmatmul.mubr.bf16.vlgmr.msra.gmra.mrb[24].mxu0 %v2388_v40 }
0x1241   : > { %4056 = vmatprep.mubr.msk.bf16.mxu0 %vm4453_vm1, %v4452_v37 }
0x1313   : > { %v2487_v41 = vpop.f32.mrb[24].mxu0 }
0x1314   : > { %v2493_v42 = vadd.f32 %v2487_v41, %v4877_v0  ;;  %v4026_v43 = vpop.f32.mrb[25].mxu0 }
0x1315   : > { %v2490_v44 = vpop.f32.mrb[26].mxu0 }
0x1316   : > { %v4913_v45 = vadd.f32 %v3731_v54, %v2493_v42  ;;  %v4027_v46 = vpop.f32.mrb[27].mxu0 }
0x1318   : > { %v2502_v47 = vsel %vm1502_vm0, %v4913_v45, 0.0 }
0x1319   : > { %2503 = vadd.xlane.f32.xlu1 %v2502_v47 }
0x13a6   : > { %v2504_v48 = vpop.xlane.xlu1 %2503 }
0x13a7   : > { %v2505_v49 = vmul.f32 0.03125, %v2504_v48  ;;  %v2600_v48 = vld [vmem:[%s5174_s10 + $0x4] sm:$0xf] }
0x13a9   : > { %v2506_v50 = vsub.f32 %v4913_v45, %v2505_v49  ;;  %v2831_v49 = vsel %vm1869_vm8, %v2600_v48, 0 }
0x13ab   : > { %v2507_v51 = vmul.f32 %v2506_v50, %v2506_v50 }
0x13ad   : > { %v2508_v52 = vsel %vm1502_vm0, %v2507_v51, 0.0 }
0x13ae   : > { %2509 = vadd.xlane.f32.xlu1 %v2508_v52 }
0x143b   : > { %v2510_v56 = vpop.xlane.xlu1 %2509 }
0x143c   : > { %v2511_v57 = vmul.f32 0.03125, %v2510_v56 }
0x143e   : > { %v2512_v58 = vadd.f32 1e-05, %v2511_v57 }
0x1440   : > { %4330 = vrsqrt.f32 %v2512_v58  ;;  %v2877_v58 = vsel %vm1869_vm8, %v2599_v55, 0 }
0x144a   : > { %v4331_v60 = vpop.eup %4330 }
0x144b   : > { %v2514_v62 = vmul.f32 %v4331_v60, %v2506_v50 }
0x144d   : > { %v2522_v0 = vmul.f32 %v3732_v61, %v2514_v62 }
0x144f   : > { %v2530_v1 = vadd.f32 %v3733_v63, %v2522_v0 }
0x1451   : > { %v2531_v2 = vpack.c.bf16 %v2530_v1, %v2530_v1 }
0x1453   : > { %4033 = vmatmul.mubr.msk.bf16.vlgmr.msra.gmra.mrb[44].mxu1 %vm1586_vm2, %v2531_v2 }
0x1454   : > { %4038 = vmatprep.mubr.msk.bf16.mxu1 %vm4453_vm1, %v4452_v37 }
0x1526   : > { %v2592_v4 = vpop.f32.mrb[44].mxu1 }
0x1527   : > { %v2593_v5 = vadd.f32 %v3734_v3, %v2592_v4  ;;  %v4034_v6 = vpop.f32.mrb[45].mxu1 }
0x1528   : > { %v2595_v7 = vpop.f32.mrb[46].mxu1 }
0x1529   : > { %v4929_v29 = vpack.c.bf16 %v2593_v5, %v2593_v5  ;;  %v4035_v8 = vpop.f32.mrb[47].mxu1  ;;  %v2598_v12 = vmul.f32 0.35355338, %v2593_v5 }
0x152b   : > { %2606 = vrot.lane.b32.xlu0 %v4929_v29, %s5170_s5  ;;  %v4935_v13 = vpack.c.bf16 %v2598_v12, %v2598_v12  ;;  %s5171_s5 = smov 64  }
0x159d   : > { %v2607_v10 = vpop.permute.xlu0 %2606 }
0x159e   : > { %v2612_v11 = vsel %vm1640_vm3, %v2607_v10, 0 }
0x159f   : > { %4037 = vmatpush3.bf16.xpose.msra.mxu1 %v2612_v11 }
0x15a0   : > { %4042 = vmatprep.subr.bf16.mxu1 %v4452_v37 }
0x15a6   : > { %4039 = vmatmul.mubr.msk.bf16.vlgmr.msra.gmra.mrb[48].mxu1 %vm1640_vm3, %v4935_v13 }
0x15a7   : > { %4044 = vmatprep.mubr.msk.bf16.mxu1 %vm4453_vm1, %v4452_v37 }
0x1679   : > { %v2648_v59 = vpop.f32.mrb[48].mxu1 }
0x167a   : > { %v4040_v14 = vpop.f32.mrb[49].mxu1  ;;  %v2654_v15 = vsel %vm1687_vm4, %v2648_v59, -inf }
0x167b   : > { %2655 = vmax.xlane.f32.xlu1 %v2654_v15  ;;  %v2651_v16 = vpop.f32.mrb[50].mxu1 }
0x167c   : > { %v4041_v17 = vpop.f32.mrb[51].mxu1 }
0x168c   : > { %2666 = vrot.lane.b32.xlu1 %v4929_v29, %s5171_s5  ;;  %s5175_s5 = smov 56  }
0x1690   : > { %2718 = vrot.lane.b32.xlu1 %v4929_v29, %s5172_s3  ;;  %s5176_s3 = smov 80  }
0x1694   : > { %2716 = vrot.lane.b32.xlu1 %v4935_v13, %s5173_s16  ;;  %s5177_s16 = smov 112  }
0x1708   : > { %v2656_v18 = vpop.xlane.xlu1 %2655 }
0x1709   : > { %v2657_v19 = vsub.f32 %v2648_v59, %v2656_v18 }
0x170b   : > { %v2658_v20 = vmul.f32 1.442695, %v2657_v19 }
0x170c   : > { %v2667_v21 = vpop.permute.xlu1 %2666 }
0x170d   : > { %4332 = vpow2.f32 %v2658_v20  ;;  %v2672_v22 = vand.u32 %v2667_v21, %v4791_v9 }
0x170f   : > { %4043 = vmatpush3.bf16.msra.mxu1 %v2672_v22 }
0x1710   : > { %4048 = vmatprep.subr.bf16.mxu1 %v4452_v37  ;;  %v2719_v28 = vpop.permute.xlu1 %2718 }
0x1711   : > { %v2724_v31 = vsel %vm1640_vm3, %v2719_v28, 0 }
0x1714   : > { %v2717_v32 = vpop.permute.xlu1 %2716 }
0x1717   : > { %v4333_v23 = vpop.eup %4332 }
0x1718   : > { %v2660_v24 = vsel %vm1687_vm4, %v4333_v23, 0.0 }
0x1719   : > { %2661 = vadd.xlane.f32.xlu0 %v2660_v24 }
0x17a6   : > { %v2662_v25 = vpop.xlane.xlu0 %2661 }
0x17a7   : > { %4334 = vrcp.f32 %v2662_v25 }
0x17b1   : > { %v4335_v26 = vpop.eup %4334 }
0x17b2   : > { %v2664_v27 = vmul.f32 %v4335_v26, %v4333_v23 }
0x17b4   : > { %v2665_v30 = vpack.c.bf16 %v2664_v27, %v2664_v27 }
0x17b6   : > { %4045 = vmatmul.mubr.msk.bf16.vlgmr.msra.gmra.mrb[52].mxu1 %vm1702_vm7, %v2665_v30 }
0x17b7   : > { %4049 = vmatpush3.bf16.xpose.msra.mxu1 %v2724_v31  ;;  %4050 = vmatprep.mubr.msk.bf16.mxu1 %vm4453_vm1, %v4452_v37 }
0x17b8   : > { %4060 = vmatprep.subr.bf16.mxu1 %v4452_v37 }
0x17be   : > { %4051 = vmatmul.mubr.msk.bf16.vlgmr.msra.gmra.mrb[56].mxu1 %vm1640_vm3, %v2717_v32 }
0x17bf   : > { %4062 = vmatprep.mubr.msk.bf16.mxu1 %vm4453_vm1, %v4452_v37  ;;  %4061 = vmatpush3.bf16.msra.mxu1 %v2831_v49 }
0x17c0   : > { %4072 = vmatprep.subr.bf16.mxu1 %v4452_v37 }
0x1889   : > { %v2708_v33 = vpop.f32.mrb[52].mxu1 }
0x188a   : > { %v4046_v34 = vpop.f32.mrb[53].mxu1  ;;  %v2714_v60 = vpack.c.bf16 %v2708_v33, %v2708_v33 }
0x188b   : > { %v2711_v35 = vpop.f32.mrb[54].mxu1  ;;  %v2601_v34 = vld [vmem:[%s5174_s10 + $0x8] sm:$0xf] }
0x188c   : > { %v4047_v36 = vpop.f32.mrb[55].mxu1  ;;  %v3034_v35 = vsel %vm1869_vm8, %v2601_v34, 0 }
0x1891   : > { %v2760_v38 = vpop.f32.mrb[56].mxu1 }
0x1892   : > { %v4052_v39 = vpop.f32.mrb[57].mxu1  ;;  %v2766_v40 = vsel %vm1687_vm4, %v2760_v38, -inf }
0x1893   : > { %2767 = vmax.xlane.f32.xlu1 %v2766_v40  ;;  %v2763_v41 = vpop.f32.mrb[58].mxu1 }
0x1894   : > { %v4053_v54 = vpop.f32.mrb[59].mxu1 }
0x1920   : > { %v2768_v42 = vpop.xlane.xlu1 %2767 }
0x1921   : > { %v2769_v43 = vsub.f32 %v2760_v38, %v2768_v42 }
0x1923   : > { %v2770_v44 = vmul.f32 1.442695, %v2769_v43 }
0x1925   : > { %4336 = vpow2.f32 %v2770_v44 }
0x192f   : > { %v4337_v46 = vpop.eup %4336 }
0x1930   : > { %v2772_v47 = vsel %vm1687_vm4, %v4337_v46, 0.0 }
0x1931   : > { %2773 = vadd.xlane.f32.xlu0 %v2772_v47 }
0x1947   : > { %2778 = vrot.lane.b32.xlu0 %v4929_v29, %s5175_s5  ;;  %s5178_s5 = smov 48  }
0x194b   : > { %2921 = vrot.lane.b32.xlu0 %v4929_v29, %s5176_s3  ;;  %s5179_s3 = smov 72  }
0x194f   : > { %2919 = vrot.lane.b32.xlu0 %v4935_v13, %s5177_s16  ;;  %s5180_s16 = smov 104  }
0x19be   : > { %v2774_v50 = vpop.xlane.xlu0 %2773 }
0x19bf   : > { %4338 = vrcp.f32 %v2774_v50 }
0x19c2   : > { %v2779_v51 = vpop.permute.xlu0 %2778 }
0x19c3   : > { %v2784_v52 = vand.u32 %v2779_v51, %v4791_v9 }
0x19c5   : > { %4055 = vmatpush3.bf16.msra.mxu0 %v2784_v52  ;;  %v2602_v52 = vld [vmem:[%s5174_s10 + $0xc] sm:$0xf] }
0x19c6   : > { %4066 = vmatprep.subr.bf16.mxu0 %v4452_v37  ;;  %v2922_v61 = vpop.permute.xlu0 %2921 }
0x19c7   : > { %v2927_v2 = vsel %vm1640_vm3, %v2922_v61, 0 }
0x19c9   : > { %v4339_v53 = vpop.eup %4338 }
0x19ca   : > { %v2776_v56 = vmul.f32 %v4339_v53, %v4337_v46  ;;  %v2920_v6 = vpop.permute.xlu0 %2919  ;;  %v3192_v53 = vsel %vm1869_vm8, %v2602_v52, 0 }
0x19cc   : > { %v2777_v57 = vpack.c.bf16 %v2776_v56, %v2776_v56 }
0x19ce   : > { %4057 = vmatmul.mubr.msk.bf16.vlgmr.msra.gmra.mrb[28].mxu0 %vm1702_vm7, %v2777_v57 }
0x19cf   : > { %4067 = vmatpush3.bf16.msra.mxu0 %v2877_v58  ;;  %4068 = vmatprep.mubr.msk.bf16.mxu0 %vm4453_vm1, %v4452_v37 }
0x19d0   : > { %4078 = vmatprep.subr.bf16.mxu0 %v4452_v37 }
0x19d6   : > { %4069 = vmatmul.mubr.msk.bf16.vlgmr.msra.gmra.mrb[32].mxu0 %vm1640_vm3, %v2714_v60 }
0x19d7   : > { %4080 = vmatprep.mubr.msk.bf16.mxu0 %vm4453_vm1, %v4452_v37 }
0x1aa1   : > { %v2820_v62 = vpop.f32.mrb[28].mxu0 }
0x1aa2   : > { %v2826_v63 = vpack.c.bf16 %v2820_v62, %v2820_v62  ;;  %v4058_v0 = vpop.f32.mrb[29].mxu0 }
0x1aa3   : > { %v2823_v1 = vpop.f32.mrb[30].mxu0 }
0x1aa4   : > { %v4059_v3 = vpop.f32.mrb[31].mxu0  ;;  %4063 = vmatmul.mubr.msk.bf16.vlgmr.msra.gmra.mrb[60].mxu1 %vm1640_vm3, %v2826_v63 }
0x1aa5   : > { %4073 = vmatpush3.bf16.xpose.msra.mxu1 %v2927_v2  ;;  %4074 = vmatprep.mubr.msk.bf16.mxu1 %vm4453_vm1, %v4452_v37 }
0x1aa6   : > { %4084 = vmatprep.subr.bf16.mxu1 %v4452_v37 }
0x1aa9   : > { %v2913_v4 = vpop.f32.mrb[32].mxu0 }
0x1aaa   : > { %v4070_v5 = vpop.f32.mrb[33].mxu0 }
0x1aab   : > { %v2916_v7 = vpop.f32.mrb[34].mxu0 }
0x1aac   : > { %v4071_v8 = vpop.f32.mrb[35].mxu0  ;;  %4075 = vmatmul.mubr.msk.bf16.vlgmr.msra.gmra.mrb[64].mxu1 %vm1640_vm3, %v2920_v6 }
0x1aad   : > { %4086 = vmatprep.mubr.msk.bf16.mxu1 %vm4453_vm1, %v4452_v37  ;;  %4085 = vmatpush3.bf16.msra.mxu1 %v3034_v35 }
0x1aae   : > { %4096 = vmatprep.subr.bf16.mxu1 %v4452_v37 }
0x1b77   : > { %v2867_v10 = vpop.f32.mrb[60].mxu1 }
0x1b78   : > { %v4989_v11 = vadd.f32 %v2913_v4, %v2867_v10  ;;  %v4064_v12 = vpop.f32.mrb[61].mxu1 }
0x1b79   : > { %v2870_v59 = vpop.f32.mrb[62].mxu1 }
0x1b7a   : > { %v4065_v14 = vpop.f32.mrb[63].mxu1 }
0x1b7f   : > { %v2963_v15 = vpop.f32.mrb[64].mxu1 }
0x1b80   : > { %v4076_v16 = vpop.f32.mrb[65].mxu1  ;;  %v2969_v17 = vsel %vm1687_vm4, %v2963_v15, -inf }
0x1b81   : > { %2970 = vmax.xlane.f32.xlu1 %v2969_v17  ;;  %v2966_v18 = vpop.f32.mrb[66].mxu1 }
0x1b82   : > { %v4077_v19 = vpop.f32.mrb[67].mxu1 }
0x1b92   : > { %2981 = vrot.lane.b32.xlu1 %v4929_v29, %s5178_s5  ;;  %s5181_s5 = smov 40  }
0x1b96   : > { %3079 = vrot.lane.b32.xlu1 %v4929_v29, %s5179_s3  ;;  %s5182_s3 = sld [smem:[#allocation18_spill]] }
0x1b9a   : > { %3077 = vrot.lane.b32.xlu1 %v4935_v13, %s5180_s16  ;;  %s5183_s16 = sld [smem:[#allocation21_spill]] }
0x1b9c   : > { %v3750_v10 = vld [vmem:[%s5182_s3] ss:$0 sm:$0xff]  ;;  %s5186_s3 = sld [smem:[#allocation23_spill]] }
0x1ba2   : > { %v4296_v34 = vld [vmem:[%s5186_s3 + $0x10] sm:$0xff]   ;;  %v4297_v35 = vld [vmem:[%s5186_s3 + $0x18] sm:$0xff]  }
0x1c0e   : > { %v2971_v20 = vpop.xlane.xlu1 %2970 }
0x1c0f   : > { %v2972_v21 = vsub.f32 %v2963_v15, %v2971_v20 }
0x1c11   : > { %v2973_v22 = vmul.f32 1.442695, %v2972_v21  ;;  %v4292_v21 = vld [vmem:[%s5183_s16] sm:$0xff]  }
0x1c12   : > { %v2982_v23 = vpop.permute.xlu1 %2981 }
0x1c13   : > { %4340 = vpow2.f32 %v2973_v22  ;;  %v2987_v24 = vand.u32 %v2982_v23, %v4791_v9 }
0x1c15   : > { %4079 = vmatpush3.bf16.msra.mxu0 %v2987_v24 }
0x1c16   : > { %4090 = vmatprep.subr.bf16.mxu0 %v4452_v37  ;;  %v3080_v13 = vpop.permute.xlu1 %3079 }
0x1c17   : > { %v3085_v32 = vsel %vm1640_vm3, %v3080_v13, 0 }
0x1c1a   : > { %v3078_v33 = vpop.permute.xlu1 %3077 }
0x1c1d   : > { %v4341_v25 = vpop.eup %4340 }
0x1c1e   : > { %v2975_v26 = vsel %vm1687_vm4, %v4341_v25, 0.0 }
0x1c1f   : > { %2976 = vadd.xlane.f32.xlu0 %v2975_v26 }
0x1cac   : > { %v2977_v27 = vpop.xlane.xlu0 %2976 }
0x1cad   : > { %4342 = vrcp.f32 %v2977_v27 }
0x1cb7   : > { %v4343_v28 = vpop.eup %4342 }
0x1cb8   : > { %v2979_v30 = vmul.f32 %v4343_v28, %v4341_v25  ;;  %v3752_v28 = vld [vmem:[%s5185_s6] ss:$0 sm:$0xff]  ;;  %s5187_s6 = sld [smem:[#allocation22_spill]] }
0x1cba   : > { %v2980_v31 = vpack.c.bf16 %v2979_v30, %v2979_v30 }
0x1cbc   : > { %4081 = vmatmul.mubr.msk.bf16.vlgmr.msra.gmra.mrb[36].mxu0 %vm1702_vm7, %v2980_v31 }
0x1cbd   : > { %4091 = vmatpush3.bf16.xpose.msra.mxu0 %v3085_v32  ;;  %4092 = vmatprep.mubr.msk.bf16.mxu0 %vm4453_vm1, %v4452_v37  ;;  %v4294_v32 = vld [vmem:[%s5186_s3] sm:$0xff]  }
0x1cbe   : > { %4102 = vmatprep.subr.bf16.mxu0 %v4452_v37 }
0x1cc4   : > { %4093 = vmatmul.mubr.msk.bf16.vlgmr.msra.gmra.mrb[40].mxu0 %vm1640_vm3, %v3078_v33  ;;  %v4295_v33 = vld [vmem:[%s5186_s3 + $0x8] sm:$0xff]  }
0x1cc5   : > { %4104 = vmatprep.mubr.msk.bf16.mxu0 %vm4453_vm1, %v4452_v37  ;;  %4103 = vmatpush3.bf16.msra.mxu0 %v3192_v53 }
0x1cc6   : > { %4116 = vmatprep.subr.bf16.mxu0 %v4452_v37 }
0x1d8f   : > { %v3023_v36 = vpop.f32.mrb[36].mxu0 }
0x1d90   : > { %v3029_v38 = vpack.c.bf16 %v3023_v36, %v3023_v36  ;;  %v4082_v39 = vpop.f32.mrb[37].mxu0  ;;  %v4298_v36 = vld [vmem:[%s5186_s3 + $0x20] sm:$0xff]  }
0x1d91   : > { %v3026_v40 = vpop.f32.mrb[38].mxu0  ;;  %v4300_v39 = vld [vmem:[%s5186_s3 + $0x30] sm:$0xff]  }
0x1d92   : > { %v4083_v41 = vpop.f32.mrb[39].mxu0  ;;  %4087 = vmatmul.mubr.msk.bf16.vlgmr.msra.gmra.mrb[68].mxu1 %vm1640_vm3, %v3029_v38  ;;  %v4299_v38 = vld [vmem:[%s5186_s3 + $0x28] sm:$0xff]   ;;  %v4301_v40 = vld [vmem:[%s5186_s3 + $0x38] sm:$0xff]  }
0x1d93   : > { %4098 = vmatprep.mubr.msk.bf16.mxu1 %vm4453_vm1, %v4452_v37  ;;  %v3753_v41 = vld [vmem:[%s5187_s6] ss:$0 sm:$0xff]  ;;  %s977_s6 = sand.u32 1, %s4410_s1  }
0x1d94   : > { %s978_s3 = scalar_lea.vmem [#allocation2], %s977_s6 }
0x1d95   : > { %s3555_s8 = sshll.u32 %s978_s3, 4  ;;  %s5077_s8 = int_to_ptr.vmem [resolvable:$true] %s3555_s8 }
0x1d96   : > { %s4356_s10 = scalar_lea.vmem %s5077_s8, 16 }
0x1d97   : > { %v3121_v54 = vpop.f32.mrb[40].mxu0  ;;  %p4357_p11 = scmp.ne.s32.totalorder %s5077_s8, %s4356_s10 }
0x1d98   : > { %v4094_v42 = vpop.f32.mrb[41].mxu0  ;;  %v3127_v43 = vsel %vm1687_vm4, %v3121_v54, -inf }
0x1d99   : > { %3128 = vmax.xlane.f32.xlu1 %v3127_v43  ;;  %v3124_v44 = vpop.f32.mrb[42].mxu0  ;;  %p4358_p12 = pnand %p4357_p11, %p4675_p5 }
0x1d9a   : > { %v4095_v46 = vpop.f32.mrb[43].mxu0 }
0x1d9b   : > { %p4359_p13 = pneg %p4358_p12 }
0x1e26   : > { %v3129_v47 = vpop.xlane.xlu1 %3128 }
0x1e27   : > { %v3130_v48 = vsub.f32 %v3121_v54, %v3129_v47 }
0x1e29   : > { %v3131_v49 = vmul.f32 1.442695, %v3130_v48 }
0x1e2b   : > { %4344 = vpow2.f32 %v3131_v49 }
0x1e35   : > { %v4345_v50 = vpop.eup %4344 }
0x1e36   : > { %v3133_v51 = vsel %vm1687_vm4, %v4345_v50, 0.0 }
0x1e37   : > { %3134 = vadd.xlane.f32.xlu0 %v3133_v51 }
0x1e4d   : > { %3139 = vrot.lane.b32.xlu0 %v4929_v29, %s5181_s5  ;;  %s5184_s5 = sld [smem:[#allocation19_spill]] }
0x1e53   : > { %v3751_v26 = vld [vmem:[%s5184_s5] ss:$0 sm:$0xff]  ;;  %s5188_s5 = sld [smem:[#allocation24_spill]] }
0x1e65   : > { %v3070_v55 = vpop.f32.mrb[68].mxu1 }
0x1e66   : > { %v3076_v56 = vadd.f32 %v3070_v55, %v4989_v11  ;;  %v4088_v57 = vpop.f32.mrb[69].mxu1 }
0x1e67   : > { %v3073_v58 = vpop.f32.mrb[70].mxu1 }
0x1e68   : > { %v4089_v60 = vpop.f32.mrb[71].mxu1 }
0x1ec4   : > { %v3135_v61 = vpop.xlane.xlu0 %3134 }
0x1ec5   : > { %4346 = vrcp.f32 %v3135_v61 }
0x1ec8   : > { %v3140_v62 = vpop.permute.xlu0 %3139 }
0x1ec9   : > { %v3145_v63 = vand.u32 %v3140_v62, %v4791_v9 }
0x1ecb   : > { %4097 = vmatpush3.bf16.msra.mxu1 %v3145_v63 }
0x1ecc   : > { %4108 = vmatprep.subr.bf16.mxu1 %v4452_v37 }
0x1ecf   : > { %v4347_v29 = vpop.eup %4346 }
0x1ed0   : > { %v3137_v0 = vmul.f32 %v4347_v29, %v4345_v50 }
0x1ed2   : > { %v3138_v1 = vpack.c.bf16 %v3137_v0, %v3137_v0 }
0x1ed4   : > { %4099 = vmatmul.mubr.msk.bf16.vlgmr.msra.gmra.mrb[72].mxu1 %vm1702_vm7, %v3138_v1 }
0x1ed5   : > { %4112 = vmatprep.mubr.msk.bf16.mxu1 %vm4453_vm1, %v4452_v37  ;;  %4109 = vmatpush3.bf16.msra.mxu1 %v4292_v21 }
0x1ed6   : > { %4110 = vmatprep.subr.bf16.mxu1 %v4452_v37 }
0x1fa7   : > { %v3181_v2 = vpop.f32.mrb[72].mxu1 }
0x1fa8   : > { %v3187_v3 = vpack.c.bf16 %v3181_v2, %v3181_v2  ;;  %v4100_v4 = vpop.f32.mrb[73].mxu1 }
0x1fa9   : > { %v3184_v5 = vpop.f32.mrb[74].mxu1  ;;  %v4302_v4 = vld [vmem:[%s4630_s20] sm:$0xff]  }
0x1faa   : > { %v4101_v6 = vpop.f32.mrb[75].mxu1  ;;  %4105 = vmatmul.mubr.msk.bf16.vlgmr.msra.gmra.mrb[44].mxu0 %vm1640_vm3, %v3187_v3  ;;  %v4303_v5 = vld [vmem:[%s4630_s20 + $0x8] sm:$0xff]  }
0x1fab   : > { %4132 = vmatprep.mubr.msk.bf16.mxu0 %vm4453_vm1, %v4452_v37  ;;  %4117 = vmatpush3.bf16.msra.mxu0 %v4294_v32 }
0x1fac   : > { %4118 = vmatprep.subr.bf16.mxu0 %v4452_v37 }
0x1faf   : > { %4119 = vmatpush3.bf16.msra.mxu0 %v4295_v33 }
0x1fb0   : > { %4120 = vmatprep.subr.bf16.mxu0 %v4452_v37 }
0x1fb3   : > { %4121 = vmatpush3.bf16.msra.mxu0 %v4296_v34 }
0x1fb4   : > { %4122 = vmatprep.subr.bf16.mxu0 %v4452_v37 }
0x1fb7   : > { %4123 = vmatpush3.bf16.msra.mxu0 %v4297_v35 }
0x1fb8   : > { %4124 = vmatprep.subr.bf16.mxu0 %v4452_v37 }
0x1fbb   : > { %4125 = vmatpush3.bf16.msra.mxu0 %v4298_v36 }
0x1fbc   : > { %4126 = vmatprep.subr.bf16.mxu0 %v4452_v37 }
0x1fbf   : > { %4127 = vmatpush3.bf16.msra.mxu0 %v4299_v38 }
0x1fc0   : > { %4128 = vmatprep.subr.bf16.mxu0 %v4452_v37 }
0x1fc3   : > { %4129 = vmatpush3.bf16.msra.mxu0 %v4300_v39 }
0x1fc4   : > { %4130 = vmatprep.subr.bf16.mxu0 %v4452_v37 }
0x1fc7   : > { %4131 = vmatpush3.bf16.msra.mxu0 %v4301_v40 }
0x207d   : > { %v3228_v9 = vpop.f32.mrb[44].mxu0 }
0x207e   : > { %v3234_v7 = vadd.f32 %v3228_v9, %v3076_v56  ;;  %v4106_v8 = vpop.f32.mrb[45].mxu0  ;;  %v3766_v56 = vld [vmem:[%s5188_s5] ss:$0 sm:$0xff]  ;;  %s3770_s5 = sshll.u32 %s4658_s0, 4  ;;  %s4466_s0 = smov [#allocation2]  }
0x207f   : > { %v3231_v11 = vpop.f32.mrb[46].mxu0  ;;  %s5075_s9 = scalar_lea.hbm %s4635_s27, %s3770_s5 }
0x2080   : > { %v3235_v12 = vadd.f32 %v3234_v7, %v4913_v45  ;;  %v4107_v59 = vpop.f32.mrb[47].mxu0  ;;  %v4293_v45 = vld [vmem:[%s5183_s16 + $0x8] sm:$0xff]  }
0x2081   : > { %4111 = vmatpush3.bf16.msra.mxu1 %v4293_v45 }
0x2082   : > { %v5033_v14 = vadd.f32 %v3750_v10, %v3235_v12  ;;  %4136 = vmatprep.subr.bf16.mxu1 %v4452_v37  ;;  %v3476_v10 = vld [vmem:[%s5189_s4] sm:$0x1]  ;;  %s3543_s4 = scalar_lea.sflag [#allocation3], %s977_s6 }
0x2083   : > { %v3478_v12 = vld [vmem:[%s5190_s12] sm:$0x1]  ;;  %s4360_s12 = sshll.u32 %s4466_s0, 4  ;;  %s4361_s12 = int_to_ptr.vmem [resolvable:$false] %s4360_s12 }
0x2084   : > { %v3244_v15 = vsel %vm1502_vm0, %v5033_v14, 0.0  ;;  %s4362_s5 = scalar_lea.vmem %s4361_s12, 32  ;;  %p4363_p0 = scmp.lt.s32.totalorder %s5077_s8, %s4361_s12 }
0x2085   : > { %3245 = vadd.xlane.f32.xlu0 %v3244_v15  ;;  %p4364_p1 = scmp.lt.s32.totalorder %s4362_s5, %s4356_s10 }
0x2087   : > { %p4365_p2 = por %p4364_p1, %p4363_p0 }
0x2089   : > { %p4366_p3 = pnand %p4365_p2, %p4359_p13 }
0x2112   : > { %v3246_v16 = vpop.xlane.xlu0 %3245 }
0x2113   : > { %v3247_v17 = vmul.f32 0.03125, %v3246_v16 }
0x2115   : > { %v3248_v18 = vsub.f32 %v5033_v14, %v3247_v17 }
0x2117   : > { %v3249_v19 = vmul.f32 %v3248_v18, %v3248_v18 }
0x2119   : > { %v3250_v20 = vsel %vm1502_vm0, %v3249_v19, 0.0 }
0x211a   : > { %3251 = vadd.xlane.f32.xlu1 %v3250_v20 }
0x21a7   : > { %v3252_v22 = vpop.xlane.xlu1 %3251 }
0x21a8   : > { %v3253_v23 = vmul.f32 0.03125, %v3252_v22 }
0x21aa   : > { %v3254_v24 = vadd.f32 1e-05, %v3253_v23 }
0x21ac   : > { %4348 = vrsqrt.f32 %v3254_v24 }
0x21b6   : > { %v4349_v25 = vpop.eup %4348 }
0x21b7   : > { %v3256_v27 = vmul.f32 %v4349_v25, %v3248_v18 }
0x21b9   : > { %v3264_v30 = vmul.f32 %v3751_v26, %v3256_v27 }
0x21bb   : > { %v3272_v13 = vadd.f32 %v3752_v28, %v3264_v30 }
0x21bd   : > { %v3273_v31 = vpack.c.bf16 %v3272_v13, %v3272_v13 }
0x21bf   : > { %4113 = vmatmul.mubr.msk.bf16.vlgmr.msra.gmra.mrb[76].mxu1 %vm1586_vm2, %v3273_v31 }
0x21c0   : > { %4140 = vmatprep.mubr.msk.bf16.mxu1 %vm4453_vm1, %v4452_v37  ;;  %4137 = vmatpush3.bf16.msra.mxu1 %v4302_v4 }
0x21c1   : > { %4138 = vmatprep.subr.bf16.mxu1 %v4452_v37 }
0x21c4   : > { %4139 = vmatpush3.bf16.msra.mxu1 %v4303_v5 }
0x2292   : > { %v3334_v54 = vpop.f32.mrb[76].mxu1 }
0x2293   : > { %v3335_v42 = vadd.f32 %v3753_v41, %v3334_v54  ;;  %v4114_v43 = vpop.f32.mrb[77].mxu1 }
0x2294   : > { %v3337_v44 = vpop.f32.mrb[78].mxu1 }
0x2295   : > { %v3757_v46 = vmul.f32 -1.702, %v3335_v42  ;;  %v4115_v47 = vpop.f32.mrb[79].mxu1 }
0x2297   : > { %v3342_v48 = vmul.f32 1.442695, %v3757_v46 }
0x2299   : > { %4350 = vpow2.f32 %v3342_v48 }
0x22a3   : > { %v4351_v49 = vpop.eup %4350 }
0x22a4   : > { %v3344_v50 = vadd.f32 1.0, %v4351_v49 }
0x22a6   : > { %4352 = vrcp.f32 %v3344_v50 }
0x22b0   : > { %v4353_v51 = vpop.eup %4352 }
0x22b1   : > { %v3347_v52 = vmul.f32 %v4353_v51, %v3335_v42 }
0x22b3   : > { %v3348_v53 = vpack.c.bf16 %v3347_v52, %v3347_v52 }
0x22b5   : > { %4133 = vmatmul.mubr.bf16.vlgmr.msra.gmra.mrb[48].mxu0 %v3348_v53 }
0x2388   : > { %v3447_v55 = vpop.f32.mrb[48].mxu0 }
0x2389   : > { %v3453_v57 = vadd.f32 %v3447_v55, %v5033_v14  ;;  %v4134_v58 = vpop.f32.mrb[49].mxu0 }
0x238a   : > { %v3450_v60 = vpop.f32.mrb[50].mxu0 }
0x238b   : > { %v4135_v61 = vpop.f32.mrb[51].mxu0  ;;  %v3461_v62 = vadd.f32 %v3766_v56, %v3453_v57 }
0x238d   : > { %v3463_v63 = vsel %vm3462_vm9, %v3461_v62, 0.0 }
0x238e   : > { %3464 = vadd.xlane.f32.xlu1 %v3463_v63 }
0x241b   : > { %v3465_v29 = vpop.xlane.xlu1 %3464 }
0x241c   : > { %v3466_v0 = vmul.f32 0.03125, %v3465_v29 }
0x241e   : > { %v3467_v1 = vsub.f32 %v3461_v62, %v3466_v0 }
0x2420   : > { %v3468_v2 = vmul.f32 %v3467_v1, %v3467_v1 }
0x2422   : > { %v3469_v3 = vsel %vm3462_vm9, %v3468_v2, 0.0 }
0x2423   : > { %3470 = vadd.xlane.f32.xlu1 %v3469_v3 }
0x24b0   : > { %v3471_v6 = vpop.xlane.xlu1 %3470 }
0x24b1   : > { %v3472_v9 = vmul.f32 0.03125, %v3471_v6 }
0x24b3   : > { %v3473_v7 = vadd.f32 1e-05, %v3472_v9 }
0x24b5   : > { %4354 = vrsqrt.f32 %v3473_v7 }
0x24bf   : > { %v4355_v8 = vpop.eup %4354 }
0x24c0   : > { %v3475_v11 = vmul.f32 %v4355_v8, %v3467_v1 }
0x24c2   : > { %v3477_v59 = vmul.f32 %v3476_v10, %v3475_v11 }
0x24c4   : > { %v3479_v14 = vadd.f32 %v3478_v12, %v3477_v59 }
0x24c6   : > { %v3480_v15 = vpack.c.bf16 %v3479_v14, %v3479_v14 }
0x24c8   : > { %4141 = vmatmul.mubr.msk.bf16.vlgmr.msra.gmra.mrb[80].mxu1 %vm1586_vm2, %v3480_v15 }
0x259b   : > { %v3534_v37 = vpop.f32.mrb[80].mxu1 }
0x259c   : > { %3541 = vst.msk [vmem:[%s978_s3] sm:$0x1] %vm3540_vm10, %v3534_v37  ;;  %v4142_v16 = vpop.f32.mrb[81].mxu1 }
0x259d   : > { %v3537_v17 = vpop.f32.mrb[82].mxu1 }
0x259e   : > { %4369 = shalt.err (!%p4366_p3)
}
0x259f   : > { %s4370_s3 = scalar_lea.hbm %s5075_s9, 16  ;;  %s4374_s6 = scalar_lea.hbm %s4635_s27, 32 }
0x25a0   : > { %p4371_p4 = scmp.ne.s32.totalorder %s5075_s9, %s4370_s3  ;;  %p4375_p9 = scmp.lt.u32.totalorder %s5075_s9, %s4635_s27 }
0x25a1   : > { %p4376_p10 = scmp.lt.u32.totalorder %s4374_s6, %s4370_s3  ;;  %p4378_p12 = scmp.lt.u32.totalorder %s4370_s3, %s5075_s9 }
0x25a2   : > { %p4372_p7 = pnand %p4371_p4, %p4675_p5 }
0x25a3   : > { %p4377_p11 = por %p4376_p10, %p4375_p9 }
0x25a4   : > { %p4373_p8 = pneg %p4372_p7 }
0x25a5   : > { %p4379_p0 = por %p4378_p12, %p4377_p11 }
0x25a7   : > { %p4380_p13 = pnand %p4379_p0, %p4373_p8 }
0x25a9   : > { %4383 = shalt.err (!%p4380_p13)
}
0x25aa   : > { %4145 = dma.vmem_to_hbm [thread:$0]  (%p4675_p5), %s5077_s8, 16, %s5075_s9, %s3543_s4   ;;  %v4143_v18 = vpop.f32.mrb[83].mxu1 }
0x25ab PF: > { %p4151_p1 = scmp.ge.s32.totalorder %s4418_s7, 2  ;;  %s3567_s12 = sand.u32 1, %s4406_s28  }
0x25ac   : > { %s3568_s10 = scalar_lea.sflag [#allocation3], %s3567_s12 }
0x25ad   : > { %p4148_p2 = pnand %p4151_p1, %p4679_p6 }
0x25af   : > { %4401 = dma.done.wait (!%p4148_p2), %s3568_s10, 16  }
0x25b0   : > { %4403 = vsyncadd (!%p4148_p2), %s3568_s10, 4294967280  ;;  %p75_p3 = scmp.ge.s32.totalorder %s4662_s11, 4   ;;  %s5191_s28 = smov %s4410_s1 }
0x25b1   : > { %s5192_s1 = smov %s4414_s2  ;;  %s5193_s2 = smov %s4673_s18 }
0x25b2   : > { %s5194_s7 = smov %s4662_s11  ;;  %77 = sbr.rel (!%p75_p3) target bundleno = 69 (0x45), region = 215 }
0x25b9   :  { %3572 = vsyncpa [#allocation3], 1 }
0x25ba   :  { %3574 = vsyncpa [#allocation3 + $0x1], 1 }

</bundles_post_ra>
